<compile_context>
chip_gen: v6e
topology: v6e:2x2x1
jax: 0.10.0
libtpu: 0.0.40
codegen_flags: <defaults>
</compile_context>

<pallas_src>
import functools

import jax
import jax.numpy as jnp
from jax.experimental import pallas as pl
from jax.experimental.pallas import tpu as pltpu


def _leaky(x, slope):
    return jnp.where(x >= 0, x, slope * x)


def _round_up(x, m):
    return (x + m - 1) // m * m


def smodel_kernel(src_ref, tgt_ref, ea_ref, x_t_ref, x_s_ref, inv_cnt_ref,
                  w_ref, b_ref, out_ref,
                  s1_ref, s2_ref, s3_ref, s4_ref,
                  *, F, FMP, F2P, S, TE, TP):
    f32, bf16 = jnp.float32, jnp.bfloat16
    t = pl.program_id(0)

    @pl.when(t == 0)
    def _init():
        z = jnp.zeros_like(s1_ref)
        s1_ref[...] = z
        s2_ref[...] = z
        s3_ref[...] = z
        s4_ref[...] = z

    def mmw(a, w):   # bf16 operands, f32 accumulation on the MXU
        return jnp.dot(a.astype(bf16), w.astype(bf16), preferred_element_type=f32)

    # ---- weight-slab row offsets (static; all multiples of 8 for f32 layout) ----
    o = 0
    w1a_x = w_ref[o:o + F, :]; o += F          # node_mlp_1 first layer, x_t[tgt] rows
    w1a_e = w_ref[o:o + F, :]; o += F          # node_mlp_1 first layer, edge_attr rows
    w1b = w_ref[o:o + FMP, :]; o += FMP        # node_mlp_1 second layer
    o_mlp2 = o

    b1a = b_ref[0:1, :]
    b1b = b_ref[1:2, :]

    # ================= edge phase (every tile of the 'arbitrary' E axis) =================
    tgt = tgt_ref[...]                         # [TE, 1] int32 (pad edges point at row 0)
    src = src_ref[...]                         # [1, TE] int32 (pad edges carry src == S)
    ea = ea_ref[...]                           # [TE, F] f32

    # One-hot gather operator for x_t[tgt], built in-kernel (exact 0/1, f32 gather).
    lane_t = jax.lax.broadcasted_iota(jnp.int32, (TE, TP), 1)
    gath = (lane_t == tgt).astype(f32)                                   # [TE, TP]
    xt_g = jnp.dot(gath, x_t_ref[...], preferred_element_type=f32)       # [TE, F]

    # node_mlp_1 with the lane-concat folded into row-split weights.
    h = mmw(xt_g, w1a_x) + mmw(ea, w1a_e) + b1a                          # [TE, FMP]
    msg = mmw(_leaky(h, 0.1), w1b) + b1b                                 # [TE, FMP]

    # Scatter operator built directly in standard orientation [S, TE]; padded
    # edges (src == S) give an all-zero column and contribute nothing.
    sub_s = jax.lax.broadcasted_iota(jnp.int32, (S, TE), 0)
    scat = (sub_s == src).astype(f32)                                    # [S, TE]

    # Single-pass raw moments; f32 values on the MXU to limit cancellation in
    # the centred 3rd/4th moments (torch reference is f32 throughout).
    msg2 = msg * msg
    s1_ref[...] += jnp.dot(scat, msg, preferred_element_type=f32)
    s2_ref[...] += jnp.dot(scat, msg2, preferred_element_type=f32)
    s3_ref[...] += jnp.dot(scat, msg2 * msg, preferred_element_type=f32)
    s4_ref[...] += jnp.dot(scat, msg2 * msg2, preferred_element_type=f32)

    # ================= node phase (last edge tile only) =================
    @pl.when(t == pl.num_programs(0) - 1)
    def _finalize():
        o2 = o_mlp2
        w2a_xs = w_ref[o2:o2 + F, :]; o2 += F
        w2a_mean = w_ref[o2:o2 + FMP, :]; o2 += FMP
        w2a_std = w_ref[o2:o2 + FMP, :]; o2 += FMP
        w2a_skew = w_ref[o2:o2 + FMP, :]; o2 += FMP
        w2a_kurt = w_ref[o2:o2 + FMP, :]; o2 += FMP
        w2b = w_ref[o2:o2 + F2P, :]

        b2a = b_ref[2:3, :]        # already contains u @ w2a_u + b2a (host-folded)
        b2b = b_ref[3:4, :]
        gamma = b_ref[4:5, :]
        beta = b_ref[5:6, :]

        # Hoisted broadcast: reused by all four raw moments.
        inv = jnp.broadcast_to(inv_cnt_ref[...], (S, FMP))
        mean = s1_ref[...] * inv
        e2 = s2_ref[...] * inv
        e3 = s3_ref[...] * inv
        e4 = s4_ref[...] * inv

        var = _leaky(e2 - mean * mean, 0.01)        # F.leaky_relu default slope
        std = jnp.sqrt(var + 1e-6)
        inv_std = jax.lax.rsqrt(var + 1e-6)         # EUP; no divides
        m2 = mean * mean
        m3c = e3 - 3.0 * mean * e2 + 2.0 * mean * m2
        m4c = e4 - 4.0 * mean * e3 + 6.0 * m2 * e2 - 3.0 * m2 * m2
        inv_std2 = inv_std * inv_std
        skew = m3c * inv_std2 * inv_std
        kurt = m4c * inv_std2 * inv_std2
        # counts are clamped >= 1 so mean/var cannot NaN; only skew/kurt can
        # (matches torch.nan_to_num semantics of the reference).
        skew = jnp.where(jnp.isnan(skew), 0.0, skew)
        kurt = jnp.where(jnp.isnan(kurt), 0.0, kurt)

        # node_mlp_2 with the concat folded into row-split weights; u in b2a.
        pre = (mmw(x_s_ref[...], w2a_xs) + mmw(mean, w2a_mean) + mmw(std, w2a_std)
               + mmw(skew, w2a_skew) + mmw(kurt, w2a_kurt) + b2a)        # [S, F2P]
        y = mmw(_leaky(pre, 0.1), w2b) + b2b                             # [S, 128] lane-dense

        # BatchNorm1d (training mode: batch stats, biased var, eps=1e-5).
        mu = jnp.mean(y, axis=0, keepdims=True)
        d = y - mu
        v = jnp.mean(d * d, axis=0, keepdims=True)
        out_ref[...] = gamma * d * jax.lax.rsqrt(v + 1e-5) + beta


def smodel_forward(x_s, x_t, edge_index, edge_attr, u, params, *, edge_tile=128):
    S, F = x_s.shape
    T = x_t.shape[0]
    E = edge_attr.shape[0]
    Fm = 2 * F
    Fm2 = 4 * Fm + 2 * F
    FMP = _round_up(Fm, 128)
    F2P = _round_up(Fm2, 128)
    FP = _round_up(F, 128)
    assert F % 8 == 0, "TODO(synk): pad feature segments for F not a multiple of 8"
    assert S % 8 == 0, "TODO(synk): mask BatchNorm batch stats for S not a multiple of 8"
    assert u.shape[0] == 1, "reference expands a single global embedding to all S rows"
    TE = int(edge_tile)
    assert TE % 128 == 0
    E_pad = _round_up(max(E, 1), TE)
    n_tiles = E_pad // TE
    TP = _round_up(T, 8)

    f32 = jnp.float32
    src = edge_index[0].astype(jnp.int32)
    tgt = edge_index[1].astype(jnp.int32)

    # Only O(E) index bytes are shipped; padded edges get src == S (-> zero
    # scatter column) and tgt == 0 (harmless gather).
    src_row = jnp.full((1, E_pad), S, jnp.int32).at[0, :E].set(src)
    tgt_col = jnp.zeros((E_pad, 1), jnp.int32).at[:E, 0].set(tgt)
    ea_p = jnp.zeros((E_pad, F), f32).at[:E].set(edge_attr.astype(f32))
    x_t_p = jnp.zeros((TP, F), f32).at[:T].set(x_t.astype(f32))

    counts = jnp.zeros((S,), f32).at[src].add(1.0)
    inv_cnt = (1.0 / jnp.maximum(counts, 1.0)).reshape(S, 1)

    # ---- one lane-dense (128-col) f32 weight slab; columns zero-padded ----
    def seg(w, rows, cols=128):
        out = jnp.zeros((rows, cols), f32)
        return out.at[:w.shape[0], :w.shape[1]].set(w.astype(f32))

    w1a, w1b = params["w1a"], params["w1b"]
    w2a, w2b = params["w2a"], params["w2b"]
    w_slab = jnp.concatenate([
        seg(w1a[:F], F),                         # w1a_x
        seg(w1a[F:], F),                         # w1a_e
        seg(w1b, FMP),
        seg(w2a[0:F], F),                        # x_s rows
        seg(w2a[F:F + Fm], FMP),                 # mean rows
        seg(w2a[F + Fm:F + 2 * Fm], FMP),        # std rows
        seg(w2a[F + 2 * Fm:F + 3 * Fm], FMP),    # skew rows
        seg(w2a[F + 3 * Fm:F + 4 * Fm], FMP),    # kurt rows
        seg(w2b, F2P),
    ], axis=0)

    # Fold u into node_mlp_2's bias once on the host (removes an M=1 matmul).
    w2a_u = w2a[F + 4 * Fm:]
    b2a_eff = u[0:1].astype(f32) @ w2a_u.astype(f32) + params["b2a"].astype(f32)

    def brow(v):
        v = v.reshape(1, -1).astype(f32)
        return jnp.pad(v, ((0, 0), (0, 128 - v.shape[1])))

    b_slab = jnp.concatenate([
        brow(params["b1a"]), brow(params["b1b"]), brow(b2a_eff), brow(params["b2b"]),
        brow(params["gamma"]), brow(params["beta"]), jnp.zeros((2, 128), f32)], axis=0)

    kernel = functools.partial(smodel_kernel, F=F, FMP=FMP, F2P=F2P, S=S, TE=TE, TP=TP)

    grid_spec = pltpu.PrefetchScalarGridSpec(
        num_scalar_prefetch=0,
        grid=(n_tiles,),
        in_specs=[
            pl.BlockSpec((1, TE), lambda t: (0, t)),         # src indices (lane-major row)
            pl.BlockSpec((TE, 1), lambda t: (t, 0)),         # tgt indices (sublane-major col)
            pl.BlockSpec((TE, F), lambda t: (t, 0)),         # edge_attr tile
            pl.BlockSpec((TP, F), lambda t: (0, 0)),         # x_t (resident)
            pl.BlockSpec((S, F), lambda t: (0, 0)),          # x_s (resident)
            pl.BlockSpec((S, 1), lambda t: (0, 0)),          # inv_cnt
            pl.BlockSpec(w_slab.shape, lambda t: (0, 0)),    # packed weights
            pl.BlockSpec(b_slab.shape, lambda t: (0, 0)),    # packed biases
        ],
        out_specs=pl.BlockSpec((S, FP), lambda t: (0, 0)),
        scratch_shapes=[pltpu.VMEM((S, FMP), jnp.float32)] * 4,
    )

    out_pad = pl.pallas_call(
        kernel,
        out_shape=jax.ShapeDtypeStruct((S, FP), jnp.float32),
        grid_spec=grid_spec,
        compiler_params=pltpu.CompilerParams(dimension_semantics=("arbitrary",)),
    )(src_row, tgt_col, ea_p, x_t_p, x_s.astype(f32), inv_cnt, w_slab, b_slab)
    return out_pad[:, :F]


def init_params(key, Fdim):
    # Weights stored as [in, out] (y = x @ W + b), equivalent to torch Linear.
    Fm = 2 * Fdim            # node_mlp_1 width
    Fm2 = 4 * Fm + 2 * Fdim  # node_mlp_2 input width (= 10 * Fdim)
    ks = jax.random.split(key, 4)
    return {
        "w1a": 0.1 * jax.random.normal(ks[0], (Fm, Fm), jnp.float32),
        "b1a": jnp.zeros((1, Fm), jnp.float32),
        "w1b": 0.1 * jax.random.normal(ks[1], (Fm, Fm), jnp.float32),
        "b1b": 0.01 * jnp.ones((1, Fm), jnp.float32),
        "w2a": 0.1 * jax.random.normal(ks[2], (Fm2, Fm2), jnp.float32),
        "b2a": jnp.zeros((1, Fm2), jnp.float32),
        "w2b": 0.1 * jax.random.normal(ks[3], (Fm2, Fdim), jnp.float32),
        "b2b": 0.01 * jnp.ones((1, Fdim), jnp.float32),
        "gamma": jnp.ones((1, Fdim), jnp.float32),   # BatchNorm1d weight
        "beta": jnp.zeros((1, Fdim), jnp.float32),   # BatchNorm1d bias
    }


if __name__ == "__main__":
    Fdim = 8
    S, T, E = 16, 12, 32

    key = jax.random.PRNGKey(0)
    k_xs, k_xt, k_ea, k_u, k_src, k_tgt, k_p = jax.random.split(key, 7)

    x_s = jax.random.normal(k_xs, (S, Fdim), jnp.float32)
    x_t = jax.random.normal(k_xt, (T, Fdim), jnp.float32)
    edge_attr = jax.random.normal(k_ea, (E, Fdim), jnp.float32)
    u = jax.random.normal(k_u, (1, Fdim), jnp.float32)          # B = 1 (expanded to S rows)
    src = jax.random.randint(k_src, (E,), 0, S, jnp.int32)
    tgt = jax.random.randint(k_tgt, (E,), 0, T, jnp.int32)
    edge_index = jnp.stack([src, tgt], axis=0)                  # [2, E]

    params = init_params(k_p, Fdim)

    out = smodel_forward(x_s, x_t, edge_index, edge_attr, u, params, edge_tile=128)
    out = jax.block_until_ready(out)

    assert out.shape == (S, Fdim)
    assert bool(jnp.all(jnp.isfinite(out)))
    print("KERNEL_OK")
</pallas_src>

<mosaic_0001>
module attributes {stable_mosaic.version = 11 : i64} {
  func.func @smodel_kernel(%arg0: i32, %arg1: memref<1x128xi32, #tpu.memory_space<vmem>>, %arg2: memref<128x1xi32, #tpu.memory_space<vmem>>, %arg3: memref<128x8xf32, #tpu.memory_space<vmem>>, %arg4: memref<16x8xf32, #tpu.memory_space<vmem>>, %arg5: memref<16x8xf32, #tpu.memory_space<vmem>>, %arg6: memref<16x1xf32, #tpu.memory_space<vmem>>, %arg7: memref<792x128xf32, #tpu.memory_space<vmem>>, %arg8: memref<8x128xf32, #tpu.memory_space<vmem>>, %arg9: memref<16x128xf32, #tpu.memory_space<vmem>>, %arg10: memref<16x128xf32, #tpu.memory_space<vmem>>, %arg11: memref<16x128xf32, #tpu.memory_space<vmem>>, %arg12: memref<16x128xf32, #tpu.memory_space<vmem>>, %arg13: memref<16x128xf32, #tpu.memory_space<vmem>>) attributes {dimension_semantics = [#tpu.dimension_semantics<arbitrary>], iteration_bounds = array<i64: 1>, scalar_prefetch = 0 : i64, scratch_operands = 4 : i64, tpu.core_type = #tpu.core_type<tc>, window_params = [{transform_indices = @transform_0, window_bounds = array<i64: 1, 128>}, {transform_indices = @transform_1, window_bounds = array<i64: 128, 1>}, {transform_indices = @transform_2, window_bounds = array<i64: 128, 8>}, {pipeline_mode = #tpu.pipeline_mode<synchronous>, transform_indices = @transform_3, window_bounds = array<i64: 16, 8>}, {pipeline_mode = #tpu.pipeline_mode<synchronous>, transform_indices = @transform_4, window_bounds = array<i64: 16, 8>}, {pipeline_mode = #tpu.pipeline_mode<synchronous>, transform_indices = @transform_5, window_bounds = array<i64: 16, 1>}, {pipeline_mode = #tpu.pipeline_mode<synchronous>, transform_indices = @transform_6, window_bounds = array<i64: 792, 128>}, {pipeline_mode = #tpu.pipeline_mode<synchronous>, transform_indices = @transform_7, window_bounds = array<i64: 8, 128>}, {pipeline_mode = #tpu.pipeline_mode<synchronous>, transform_indices = @transform_8, window_bounds = array<i64: 16, 128>}]} {
    %c0_i32 = arith.constant 0 : i32
    %0 = arith.cmpi eq, %arg0, %c0_i32 : i32
    %1 = arith.extui %0 : i1 to i32
    %c0_i32_0 = arith.constant 0 : i32
    %2 = arith.cmpi ne, %1, %c0_i32_0 : i32
    scf.if %2 {
      %cst_42 = arith.constant 0.000000e+00 : f32
      %64 = vector.broadcast %cst_42 : f32 to vector<16x128xf32>
      %c0_43 = arith.constant 0 : index
      %c0_44 = arith.constant 0 : index
      %65 = vector.load %arg10[%c0_43, %c0_44] : memref<16x128xf32, #tpu.memory_space<vmem>>, vector<16x128xf32>
      tpu.vector_store %arg10[%c0_43, %c0_44], %64 {strides = array<i32>} : memref<16x128xf32, #tpu.memory_space<vmem>>, vector<16x128xf32>,
      %c0_45 = arith.constant 0 : index
      %c0_46 = arith.constant 0 : index
      %66 = vector.load %arg11[%c0_45, %c0_46] : memref<16x128xf32, #tpu.memory_space<vmem>>, vector<16x128xf32>
      tpu.vector_store %arg11[%c0_45, %c0_46], %64 {strides = array<i32>} : memref<16x128xf32, #tpu.memory_space<vmem>>, vector<16x128xf32>,
      %c0_47 = arith.constant 0 : index
      %c0_48 = arith.constant 0 : index
      %67 = vector.load %arg12[%c0_47, %c0_48] : memref<16x128xf32, #tpu.memory_space<vmem>>, vector<16x128xf32>
      tpu.vector_store %arg12[%c0_47, %c0_48], %64 {strides = array<i32>} : memref<16x128xf32, #tpu.memory_space<vmem>>, vector<16x128xf32>,
      %c0_49 = arith.constant 0 : index
      %c0_50 = arith.constant 0 : index
      %68 = vector.load %arg13[%c0_49, %c0_50] : memref<16x128xf32, #tpu.memory_space<vmem>>, vector<16x128xf32>
      tpu.vector_store %arg13[%c0_49, %c0_50], %64 {strides = array<i32>} : memref<16x128xf32, #tpu.memory_space<vmem>>, vector<16x128xf32>,
    } else {
    }
    %c0 = arith.constant 0 : index
    %c0_1 = arith.constant 0 : index
    %3 = vector.load %arg7[%c0, %c0_1] : memref<792x128xf32, #tpu.memory_space<vmem>>, vector<8x128xf32>
    %c8 = arith.constant 8 : index
    %c0_2 = arith.constant 0 : index
    %4 = vector.load %arg7[%c8, %c0_2] : memref<792x128xf32, #tpu.memory_space<vmem>>, vector<8x128xf32>
    %c16 = arith.constant 16 : index
    %c0_3 = arith.constant 0 : index
    %5 = vector.load %arg7[%c16, %c0_3] : memref<792x128xf32, #tpu.memory_space<vmem>>, vector<128x128xf32>
    %c0_4 = arith.constant 0 : index
    %c0_5 = arith.constant 0 : index
    %6 = vector.load %arg8[%c0_4, %c0_5] : memref<8x128xf32, #tpu.memory_space<vmem>>, vector<1x128xf32>
    %c1 = arith.constant 1 : index
    %c0_6 = arith.constant 0 : index
    %7 = vector.load %arg8[%c1, %c0_6] : memref<8x128xf32, #tpu.memory_space<vmem>>, vector<1x128xf32>
    %c0_7 = arith.constant 0 : index
    %c0_8 = arith.constant 0 : index
    %8 = vector.load %arg2[%c0_7, %c0_8] : memref<128x1xi32, #tpu.memory_space<vmem>>, vector<128x1xi32>
    %c0_9 = arith.constant 0 : index
    %c0_10 = arith.constant 0 : index
    %9 = vector.load %arg1[%c0_9, %c0_10] : memref<1x128xi32, #tpu.memory_space<vmem>>, vector<1x128xi32>
    %c0_11 = arith.constant 0 : index
    %c0_12 = arith.constant 0 : index
    %10 = vector.load %arg3[%c0_11, %c0_12] : memref<128x8xf32, #tpu.memory_space<vmem>>, vector<128x8xf32>
    %11 = tpu.iota {dimensions = array<i32: 1>} : vector<128x16xi32>
    %12 = vector.broadcast %8 : vector<128x1xi32> to vector<128x16xi32>
    %13 = arith.cmpi eq, %11, %12 : vector<128x16xi32>
    %14 = arith.extui %13 : vector<128x16xi1> to vector<128x16xi32>
    %15 = arith.sitofp %14 : vector<128x16xi32> to vector<128x16xf32>
    %c0_13 = arith.constant 0 : index
    %c0_14 = arith.constant 0 : index
    %16 = vector.load %arg4[%c0_13, %c0_14] : memref<16x8xf32, #tpu.memory_space<vmem>>, vector<16x8xf32>
    %cst = arith.constant dense<0.000000e+00> : vector<128x8xf32>
    %17 = tpu.matmul %15, %16, %cst {dimension_numbers = #tpu.dot_dimension_numbers<[1], [0], [0], [1], [0, 0, 1, 1], [], []>} : vector<128x16xf32>, vector<16x8xf32>, vector<128x8xf32> -> vector<128x8xf32>
    %18 = arith.truncf %17 : vector<128x8xf32> to vector<128x8xbf16>
    %19 = arith.truncf %3 : vector<8x128xf32> to vector<8x128xbf16>
    %cst_15 = arith.constant dense<0.000000e+00> : vector<128x128xf32>
    %20 = tpu.matmul %18, %19, %cst_15 {dimension_numbers = #tpu.dot_dimension_numbers<[1], [0], [0], [1], [0, 0, 1, 1], [], []>} : vector<128x8xbf16>, vector<8x128xbf16>, vector<128x128xf32> -> vector<128x128xf32>
    %21 = arith.truncf %10 : vector<128x8xf32> to vector<128x8xbf16>
    %22 = arith.truncf %4 : vector<8x128xf32> to vector<8x128xbf16>
    %cst_16 = arith.constant dense<0.000000e+00> : vector<128x128xf32>
    %23 = tpu.matmul %21, %22, %cst_16 {dimension_numbers = #tpu.dot_dimension_numbers<[1], [0], [0], [1], [0, 0, 1, 1], [], []>} : vector<128x8xbf16>, vector<8x128xbf16>, vector<128x128xf32> -> vector<128x128xf32>
    %24 = arith.addf %20, %23 : vector<128x128xf32>
    %25 = vector.broadcast %6 : vector<1x128xf32> to vector<128x128xf32>
    %26 = arith.addf %24, %25 : vector<128x128xf32>
    %cst_17 = arith.constant 0.000000e+00 : f32
    %27 = vector.broadcast %cst_17 : f32 to vector<128x128xf32>
    %28 = arith.cmpf oge, %26, %27 : vector<128x128xf32>
    %cst_18 = arith.constant 1.000000e-01 : f32
    %29 = vector.broadcast %cst_18 : f32 to vector<128x128xf32>
    %30 = arith.mulf %29, %26 : vector<128x128xf32>
    %31 = arith.select %28, %26, %30 : vector<128x128xi1>, vector<128x128xf32>
    %32 = arith.truncf %31 : vector<128x128xf32> to vector<128x128xbf16>
    %33 = arith.truncf %5 : vector<128x128xf32> to vector<128x128xbf16>
    %cst_19 = arith.constant dense<0.000000e+00> : vector<128x128xf32>
    %34 = tpu.matmul %32, %33, %cst_19 {dimension_numbers = #tpu.dot_dimension_numbers<[1], [0], [0], [1], [0, 0, 1, 1], [], []>} : vector<128x128xbf16>, vector<128x128xbf16>, vector<128x128xf32> -> vector<128x128xf32>
    %35 = vector.broadcast %7 : vector<1x128xf32> to vector<128x128xf32>
    %36 = arith.addf %34, %35 : vector<128x128xf32>
    %37 = tpu.iota {dimensions = array<i32: 0>} : vector<16x128xi32>
    %38 = vector.broadcast %9 : vector<1x128xi32> to vector<16x128xi32>
    %39 = arith.cmpi eq, %37, %38 : vector<16x128xi32>
    %40 = arith.extui %39 : vector<16x128xi1> to vector<16x128xi32>
    %41 = arith.sitofp %40 : vector<16x128xi32> to vector<16x128xf32>
    %42 = arith.mulf %36, %36 : vector<128x128xf32>
    %c0_20 = arith.constant 0 : index
    %c0_21 = arith.constant 0 : index
    %43 = vector.load %arg10[%c0_20, %c0_21] : memref<16x128xf32, #tpu.memory_space<vmem>>, vector<16x128xf32>
    %cst_22 = arith.constant dense<0.000000e+00> : vector<16x128xf32>
    %44 = tpu.matmul %41, %36, %cst_22 {dimension_numbers = #tpu.dot_dimension_numbers<[1], [0], [0], [1], [0, 0, 1, 1], [], []>} : vector<16x128xf32>, vector<128x128xf32>, vector<16x128xf32> -> vector<16x128xf32>
    %45 = arith.addf %43, %44 : vector<16x128xf32>
    %c0_23 = arith.constant 0 : index
    %c0_24 = arith.constant 0 : index
    %46 = vector.load %arg10[%c0_23, %c0_24] : memref<16x128xf32, #tpu.memory_space<vmem>>, vector<16x128xf32>
    tpu.vector_store %arg10[%c0_23, %c0_24], %45 {strides = array<i32>} : memref<16x128xf32, #tpu.memory_space<vmem>>, vector<16x128xf32>,
    %c0_25 = arith.constant 0 : index
    %c0_26 = arith.constant 0 : index
    %47 = vector.load %arg11[%c0_25, %c0_26] : memref<16x128xf32, #tpu.memory_space<vmem>>, vector<16x128xf32>
    %cst_27 = arith.constant dense<0.000000e+00> : vector<16x128xf32>
    %48 = tpu.matmul %41, %42, %cst_27 {dimension_numbers = #tpu.dot_dimension_numbers<[1], [0], [0], [1], [0, 0, 1, 1], [], []>} : vector<16x128xf32>, vector<128x128xf32>, vector<16x128xf32> -> vector<16x128xf32>
    %49 = arith.addf %47, %48 : vector<16x128xf32>
    %c0_28 = arith.constant 0 : index
    %c0_29 = arith.constant 0 : index
    %50 = vector.load %arg11[%c0_28, %c0_29] : memref<16x128xf32, #tpu.memory_space<vmem>>, vector<16x128xf32>
    tpu.vector_store %arg11[%c0_28, %c0_29], %49 {strides = array<i32>} : memref<16x128xf32, #tpu.memory_space<vmem>>, vector<16x128xf32>,
    %c0_30 = arith.constant 0 : index
    %c0_31 = arith.constant 0 : index
    %51 = vector.load %arg12[%c0_30, %c0_31] : memref<16x128xf32, #tpu.memory_space<vmem>>, vector<16x128xf32>
    %52 = arith.mulf %42, %36 : vector<128x128xf32>
    %cst_32 = arith.constant dense<0.000000e+00> : vector<16x128xf32>
    %53 = tpu.matmul %41, %52, %cst_32 {dimension_numbers = #tpu.dot_dimension_numbers<[1], [0], [0], [1], [0, 0, 1, 1], [], []>} : vector<16x128xf32>, vector<128x128xf32>, vector<16x128xf32> -> vector<16x128xf32>
    %54 = arith.addf %51, %53 : vector<16x128xf32>
    %c0_33 = arith.constant 0 : index
    %c0_34 = arith.constant 0 : index
    %55 = vector.load %arg12[%c0_33, %c0_34] : memref<16x128xf32, #tpu.memory_space<vmem>>, vector<16x128xf32>
    tpu.vector_store %arg12[%c0_33, %c0_34], %54 {strides = array<i32>} : memref<16x128xf32, #tpu.memory_space<vmem>>, vector<16x128xf32>,
    %c0_35 = arith.constant 0 : index
    %c0_36 = arith.constant 0 : index
    %56 = vector.load %arg13[%c0_35, %c0_36] : memref<16x128xf32, #tpu.memory_space<vmem>>, vector<16x128xf32>
    %57 = arith.mulf %42, %42 : vector<128x128xf32>
    %cst_37 = arith.constant dense<0.000000e+00> : vector<16x128xf32>
    %58 = tpu.matmul %41, %57, %cst_37 {dimension_numbers = #tpu.dot_dimension_numbers<[1], [0], [0], [1], [0, 0, 1, 1], [], []>} : vector<16x128xf32>, vector<128x128xf32>, vector<16x128xf32> -> vector<16x128xf32>
    %59 = arith.addf %56, %58 : vector<16x128xf32>
    %c0_38 = arith.constant 0 : index
    %c0_39 = arith.constant 0 : index
    %60 = vector.load %arg13[%c0_38, %c0_39] : memref<16x128xf32, #tpu.memory_space<vmem>>, vector<16x128xf32>
    tpu.vector_store %arg13[%c0_38, %c0_39], %59 {strides = array<i32>} : memref<16x128xf32, #tpu.memory_space<vmem>>, vector<16x128xf32>,
    %c0_i32_40 = arith.constant 0 : i32
    %61 = arith.cmpi eq, %arg0, %c0_i32_40 : i32
    %62 = arith.extui %61 : i1 to i32
    %c0_i32_41 = arith.constant 0 : i32
    %63 = arith.cmpi ne, %62, %c0_i32_41 : i32
    scf.if %63 {
      %c144 = arith.constant 144 : index
      %c0_42 = arith.constant 0 : index
      %64 = vector.load %arg7[%c144, %c0_42] : memref<792x128xf32, #tpu.memory_space<vmem>>, vector<8x128xf32>
      %c152 = arith.constant 152 : index
      %c0_43 = arith.constant 0 : index
      %65 = vector.load %arg7[%c152, %c0_43] : memref<792x128xf32, #tpu.memory_space<vmem>>, vector<128x128xf32>
      %c280 = arith.constant 280 : index
      %c0_44 = arith.constant 0 : index
      %66 = vector.load %arg7[%c280, %c0_44] : memref<792x128xf32, #tpu.memory_space<vmem>>, vector<128x128xf32>
      %c408 = arith.constant 408 : index
      %c0_45 = arith.constant 0 : index
      %67 = vector.load %arg7[%c408, %c0_45] : memref<792x128xf32, #tpu.memory_space<vmem>>, vector<128x128xf32>
      %c536 = arith.constant 536 : index
      %c0_46 = arith.constant 0 : index
      %68 = vector.load %arg7[%c536, %c0_46] : memref<792x128xf32, #tpu.memory_space<vmem>>, vector<128x128xf32>
      %c664 = arith.constant 664 : index
      %c0_47 = arith.constant 0 : index
      %69 = vector.load %arg7[%c664, %c0_47] : memref<792x128xf32, #tpu.memory_space<vmem>>, vector<128x128xf32>
      %c2 = arith.constant 2 : index
      %c0_48 = arith.constant 0 : index
      %70 = vector.load %arg8[%c2, %c0_48] : memref<8x128xf32, #tpu.memory_space<vmem>>, vector<1x128xf32>
      %c3 = arith.constant 3 : index
      %c0_49 = arith.constant 0 : index
      %71 = vector.load %arg8[%c3, %c0_49] : memref<8x128xf32, #tpu.memory_space<vmem>>, vector<1x128xf32>
      %c4 = arith.constant 4 : index
      %c0_50 = arith.constant 0 : index
      %72 = vector.load %arg8[%c4, %c0_50] : memref<8x128xf32, #tpu.memory_space<vmem>>, vector<1x128xf32>
      %c5 = arith.constant 5 : index
      %c0_51 = arith.constant 0 : index
      %73 = vector.load %arg8[%c5, %c0_51] : memref<8x128xf32, #tpu.memory_space<vmem>>, vector<1x128xf32>
      %c0_52 = arith.constant 0 : index
      %c0_53 = arith.constant 0 : index
      %74 = vector.load %arg6[%c0_52, %c0_53] : memref<16x1xf32, #tpu.memory_space<vmem>>, vector<16x1xf32>
      %75 = vector.shape_cast %74 : vector<16x1xf32> to vector<16x1xf32>
      %76 = vector.broadcast %75 : vector<16x1xf32> to vector<16x128xf32>
      %c0_54 = arith.constant 0 : index
      %c0_55 = arith.constant 0 : index
      %77 = vector.load %arg10[%c0_54, %c0_55] : memref<16x128xf32, #tpu.memory_space<vmem>>, vector<16x128xf32>
      %78 = arith.mulf %77, %76 : vector<16x128xf32>
      %c0_56 = arith.constant 0 : index
      %c0_57 = arith.constant 0 : index
      %79 = vector.load %arg11[%c0_56, %c0_57] : memref<16x128xf32, #tpu.memory_space<vmem>>, vector<16x128xf32>
      %80 = arith.mulf %79, %76 : vector<16x128xf32>
      %c0_58 = arith.constant 0 : index
      %c0_59 = arith.constant 0 : index
      %81 = vector.load %arg12[%c0_58, %c0_59] : memref<16x128xf32, #tpu.memory_space<vmem>>, vector<16x128xf32>
      %82 = arith.mulf %81, %76 : vector<16x128xf32>
      %c0_60 = arith.constant 0 : index
      %c0_61 = arith.constant 0 : index
      %83 = vector.load %arg13[%c0_60, %c0_61] : memref<16x128xf32, #tpu.memory_space<vmem>>, vector<16x128xf32>
      %84 = arith.mulf %83, %76 : vector<16x128xf32>
      %85 = arith.mulf %78, %78 : vector<16x128xf32>
      %86 = arith.subf %80, %85 : vector<16x128xf32>
      %cst_62 = arith.constant 0.000000e+00 : f32
      %87 = vector.broadcast %cst_62 : f32 to vector<16x128xf32>
      %88 = arith.cmpf oge, %86, %87 : vector<16x128xf32>
      %cst_63 = arith.constant 0.00999999977 : f32
      %89 = vector.broadcast %cst_63 : f32 to vector<16x128xf32>
      %90 = arith.mulf %89, %86 : vector<16x128xf32>
      %91 = arith.select %88, %86, %90 : vector<16x128xi1>, vector<16x128xf32>
      %cst_64 = arith.constant 9.99999997E-7 : f32
      %92 = vector.broadcast %cst_64 : f32 to vector<16x128xf32>
      %93 = arith.addf %91, %92 : vector<16x128xf32>
      %94 = math.sqrt %93 : vector<16x128xf32>
      %cst_65 = arith.constant 9.99999997E-7 : f32
      %95 = vector.broadcast %cst_65 : f32 to vector<16x128xf32>
      %96 = arith.addf %91, %95 : vector<16x128xf32>
      %97 = math.rsqrt %96 : vector<16x128xf32>
      %98 = arith.mulf %78, %78 : vector<16x128xf32>
      %cst_66 = arith.constant 3.000000e+00 : f32
      %99 = vector.broadcast %cst_66 : f32 to vector<16x128xf32>
      %100 = arith.mulf %99, %78 : vector<16x128xf32>
      %101 = arith.mulf %100, %80 : vector<16x128xf32>
      %102 = arith.subf %82, %101 : vector<16x128xf32>
      %cst_67 = arith.constant 2.000000e+00 : f32
      %103 = vector.broadcast %cst_67 : f32 to vector<16x128xf32>
      %104 = arith.mulf %103, %78 : vector<16x128xf32>
      %105 = arith.mulf %104, %98 : vector<16x128xf32>
      %106 = arith.addf %102, %105 : vector<16x128xf32>
      %cst_68 = arith.constant 4.000000e+00 : f32
      %107 = vector.broadcast %cst_68 : f32 to vector<16x128xf32>
      %108 = arith.mulf %107, %78 : vector<16x128xf32>
      %109 = arith.mulf %108, %82 : vector<16x128xf32>
      %110 = arith.subf %84, %109 : vector<16x128xf32>
      %cst_69 = arith.constant 6.000000e+00 : f32
      %111 = vector.broadcast %cst_69 : f32 to vector<16x128xf32>
      %112 = arith.mulf %111, %98 : vector<16x128xf32>
      %113 = arith.mulf %112, %80 : vector<16x128xf32>
      %114 = arith.addf %110, %113 : vector<16x128xf32>
      %cst_70 = arith.constant 3.000000e+00 : f32
      %115 = vector.broadcast %cst_70 : f32 to vector<16x128xf32>
      %116 = arith.mulf %115, %98 : vector<16x128xf32>
      %117 = arith.mulf %116, %98 : vector<16x128xf32>
      %118 = arith.subf %114, %117 : vector<16x128xf32>
      %119 = arith.mulf %97, %97 : vector<16x128xf32>
      %120 = arith.mulf %106, %119 : vector<16x128xf32>
      %121 = arith.mulf %120, %97 : vector<16x128xf32>
      %122 = arith.mulf %118, %119 : vector<16x128xf32>
      %123 = arith.mulf %122, %119 : vector<16x128xf32>
      %124 = arith.cmpf one, %121, %121 : vector<16x128xf32>
      %cst_71 = arith.constant 0.000000e+00 : f32
      %125 = vector.broadcast %cst_71 : f32 to vector<16x128xf32>
      %126 = arith.select %124, %125, %121 : vector<16x128xi1>, vector<16x128xf32>
      %127 = arith.cmpf one, %123, %123 : vector<16x128xf32>
      %cst_72 = arith.constant 0.000000e+00 : f32
      %128 = vector.broadcast %cst_72 : f32 to vector<16x128xf32>
      %129 = arith.select %127, %128, %123 : vector<16x128xi1>, vector<16x128xf32>
      %c0_73 = arith.constant 0 : index
      %c0_74 = arith.constant 0 : index
      %130 = vector.load %arg5[%c0_73, %c0_74] : memref<16x8xf32, #tpu.memory_space<vmem>>, vector<16x8xf32>
      %131 = arith.truncf %130 : vector<16x8xf32> to vector<16x8xbf16>
      %132 = arith.truncf %64 : vector<8x128xf32> to vector<8x128xbf16>
      %cst_75 = arith.constant dense<0.000000e+00> : vector<16x128xf32>
      %133 = tpu.matmul %131, %132, %cst_75 {dimension_numbers = #tpu.dot_dimension_numbers<[1], [0], [0], [1], [0, 0, 1, 1], [], []>} : vector<16x8xbf16>, vector<8x128xbf16>, vector<16x128xf32> -> vector<16x128xf32>
      %134 = arith.truncf %78 : vector<16x128xf32> to vector<16x128xbf16>
      %135 = arith.truncf %65 : vector<128x128xf32> to vector<128x128xbf16>
      %cst_76 = arith.constant dense<0.000000e+00> : vector<16x128xf32>
      %136 = tpu.matmul %134, %135, %cst_76 {dimension_numbers = #tpu.dot_dimension_numbers<[1], [0], [0], [1], [0, 0, 1, 1], [], []>} : vector<16x128xbf16>, vector<128x128xbf16>, vector<16x128xf32> -> vector<16x128xf32>
      %137 = arith.addf %133, %136 : vector<16x128xf32>
      %138 = arith.truncf %94 : vector<16x128xf32> to vector<16x128xbf16>
      %139 = arith.truncf %66 : vector<128x128xf32> to vector<128x128xbf16>
      %cst_77 = arith.constant dense<0.000000e+00> : vector<16x128xf32>
      %140 = tpu.matmul %138, %139, %cst_77 {dimension_numbers = #tpu.dot_dimension_numbers<[1], [0], [0], [1], [0, 0, 1, 1], [], []>} : vector<16x128xbf16>, vector<128x128xbf16>, vector<16x128xf32> -> vector<16x128xf32>
      %141 = arith.addf %137, %140 : vector<16x128xf32>
      %142 = arith.truncf %126 : vector<16x128xf32> to vector<16x128xbf16>
      %143 = arith.truncf %67 : vector<128x128xf32> to vector<128x128xbf16>
      %cst_78 = arith.constant dense<0.000000e+00> : vector<16x128xf32>
      %144 = tpu.matmul %142, %143, %cst_78 {dimension_numbers = #tpu.dot_dimension_numbers<[1], [0], [0], [1], [0, 0, 1, 1], [], []>} : vector<16x128xbf16>, vector<128x128xbf16>, vector<16x128xf32> -> vector<16x128xf32>
      %145 = arith.addf %141, %144 : vector<16x128xf32>
      %146 = arith.truncf %129 : vector<16x128xf32> to vector<16x128xbf16>
      %147 = arith.truncf %68 : vector<128x128xf32> to vector<128x128xbf16>
      %cst_79 = arith.constant dense<0.000000e+00> : vector<16x128xf32>
      %148 = tpu.matmul %146, %147, %cst_79 {dimension_numbers = #tpu.dot_dimension_numbers<[1], [0], [0], [1], [0, 0, 1, 1], [], []>} : vector<16x128xbf16>, vector<128x128xbf16>, vector<16x128xf32> -> vector<16x128xf32>
      %149 = arith.addf %145, %148 : vector<16x128xf32>
      %150 = vector.broadcast %70 : vector<1x128xf32> to vector<16x128xf32>
      %151 = arith.addf %149, %150 : vector<16x128xf32>
      %cst_80 = arith.constant 0.000000e+00 : f32
      %152 = vector.broadcast %cst_80 : f32 to vector<16x128xf32>
      %153 = arith.cmpf oge, %151, %152 : vector<16x128xf32>
      %cst_81 = arith.constant 1.000000e-01 : f32
      %154 = vector.broadcast %cst_81 : f32 to vector<16x128xf32>
      %155 = arith.mulf %154, %151 : vector<16x128xf32>
      %156 = arith.select %153, %151, %155 : vector<16x128xi1>, vector<16x128xf32>
      %157 = arith.truncf %156 : vector<16x128xf32> to vector<16x128xbf16>
      %158 = arith.truncf %69 : vector<128x128xf32> to vector<128x128xbf16>
      %cst_82 = arith.constant dense<0.000000e+00> : vector<16x128xf32>
      %159 = tpu.matmul %157, %158, %cst_82 {dimension_numbers = #tpu.dot_dimension_numbers<[1], [0], [0], [1], [0, 0, 1, 1], [], []>} : vector<16x128xbf16>, vector<128x128xbf16>, vector<16x128xf32> -> vector<16x128xf32>
      %160 = vector.broadcast %71 : vector<1x128xf32> to vector<16x128xf32>
      %161 = arith.addf %159, %160 : vector<16x128xf32>
      %cst_83 = arith.constant dense<0.000000e+00> : vector<128xf32>
      %162 = vector.multi_reduction <add>, %161, %cst_83 [0] : vector<16x128xf32> to vector<128xf32>
      %163 = vector.shape_cast %162 : vector<128xf32> to vector<1x128xf32>
      %cst_84 = arith.constant 1.600000e+01 : f32
      %164 = vector.broadcast %cst_84 : f32 to vector<1x128xf32>
      %165 = arith.divf %163, %164 : vector<1x128xf32>
      %166 = vector.broadcast %165 : vector<1x128xf32> to vector<16x128xf32>
      %167 = arith.subf %161, %166 : vector<16x128xf32>
      %168 = arith.mulf %167, %167 : vector<16x128xf32>
      %cst_85 = arith.constant dense<0.000000e+00> : vector<128xf32>
      %169 = vector.multi_reduction <add>, %168, %cst_85 [0] : vector<16x128xf32> to vector<128xf32>
      %170 = vector.shape_cast %169 : vector<128xf32> to vector<1x128xf32>
      %cst_86 = arith.constant 1.600000e+01 : f32
      %171 = vector.broadcast %cst_86 : f32 to vector<1x128xf32>
      %172 = arith.divf %170, %171 : vector<1x128xf32>
      %173 = vector.broadcast %72 : vector<1x128xf32> to vector<16x128xf32>
      %174 = arith.mulf %173, %167 : vector<16x128xf32>
      %cst_87 = arith.constant 9.99999974E-6 : f32
      %175 = vector.broadcast %cst_87 : f32 to vector<1x128xf32>
      %176 = arith.addf %172, %175 : vector<1x128xf32>
      %177 = math.rsqrt %176 : vector<1x128xf32>
      %178 = vector.broadcast %177 : vector<1x128xf32> to vector<16x128xf32>
      %179 = arith.mulf %174, %178 : vector<16x128xf32>
      %180 = vector.broadcast %73 : vector<1x128xf32> to vector<16x128xf32>
      %181 = arith.addf %179, %180 : vector<16x128xf32>
      %c0_88 = arith.constant 0 : index
      %c0_89 = arith.constant 0 : index
      %182 = vector.load %arg9[%c0_88, %c0_89] : memref<16x128xf32, #tpu.memory_space<vmem>>, vector<16x128xf32>
      tpu.vector_store %arg9[%c0_88, %c0_89], %181 {strides = array<i32>} : memref<16x128xf32, #tpu.memory_space<vmem>>, vector<16x128xf32>,
    } else {
    }
    return
  }
  func.func @transform_0(%arg0: i32) -> (i32, i32) {
    %c0_i32 = arith.constant 0 : i32
    %c0_i32_0 = arith.constant 0 : i32
    return %c0_i32, %arg0 : i32, i32
  }
  func.func @transform_1(%arg0: i32) -> (i32, i32) {
    %c0_i32 = arith.constant 0 : i32
    %c0_i32_0 = arith.constant 0 : i32
    return %arg0, %c0_i32 : i32, i32
  }
  func.func @transform_2(%arg0: i32) -> (i32, i32) {
    %c0_i32 = arith.constant 0 : i32
    %c0_i32_0 = arith.constant 0 : i32
    return %arg0, %c0_i32 : i32, i32
  }
  func.func @transform_3(%arg0: i32) -> (i32, i32) {
    %c0_i32 = arith.constant 0 : i32
    %c0_i32_0 = arith.constant 0 : i32
    %c0_i32_1 = arith.constant 0 : i32
    return %c0_i32, %c0_i32_0 : i32, i32
  }
  func.func @transform_4(%arg0: i32) -> (i32, i32) {
    %c0_i32 = arith.constant 0 : i32
    %c0_i32_0 = arith.constant 0 : i32
    %c0_i32_1 = arith.constant 0 : i32
    return %c0_i32, %c0_i32_0 : i32, i32
  }
  func.func @transform_5(%arg0: i32) -> (i32, i32) {
    %c0_i32 = arith.constant 0 : i32
    %c0_i32_0 = arith.constant 0 : i32
    %c0_i32_1 = arith.constant 0 : i32
    return %c0_i32, %c0_i32_0 : i32, i32
  }
  func.func @transform_6(%arg0: i32) -> (i32, i32) {
    %c0_i32 = arith.constant 0 : i32
    %c0_i32_0 = arith.constant 0 : i32
    %c0_i32_1 = arith.constant 0 : i32
    return %c0_i32, %c0_i32_0 : i32, i32
  }
  func.func @transform_7(%arg0: i32) -> (i32, i32) {
    %c0_i32 = arith.constant 0 : i32
    %c0_i32_0 = arith.constant 0 : i32
    %c0_i32_1 = arith.constant 0 : i32
    return %c0_i32, %c0_i32_0 : i32, i32
  }
  func.func @transform_8(%arg0: i32) -> (i32, i32) {
    %c0_i32 = arith.constant 0 : i32
    %c0_i32_0 = arith.constant 0 : i32
    %c0_i32_1 = arith.constant 0 : i32
    return %c0_i32, %c0_i32_0 : i32, i32
  }
}

</mosaic_0001>

<bundles_post_ra>
// kernel: tpu_custom_call.1
= control target key start
LH: loop header
LB: loop body
LE: loop exit
PB: predicated region body
PF: predicated region fallthrough
CT: control target
= control target key end

     0   :  { %13 = vsyncpa [#allocation7], 0  ;;  %s3188_s0 = inlined_call_operand.vmem [shape: s32[1,128], index: 0, kind: input, shape index: {}]   ;;  %s3189_s1 = inlined_call_operand.vmem [shape: s32[128,1], index: 1, kind: input, shape index: {}]   ;;  %s3190_s2 = inlined_call_operand.vmem [shape: f32[128,8], index: 2, kind: input, shape index: {}]   ;;  %s3191_s3 = inlined_call_operand.vmem [shape: f32[16,8], index: 3, kind: input, shape index: {}]   ;;  %s3192_s4 = inlined_call_operand.vmem [shape: f32[16,8], index: 4, kind: input, shape index: {}]   ;;  %s3193_s5 = inlined_call_operand.vmem [shape: f32[16,1], index: 5, kind: input, shape index: {}]   ;;  %s3194_s6 = inlined_call_operand.hbm [shape: f32[792,128], index: 6, kind: input, shape index: {}]   ;;  %s3195_s7 = inlined_call_operand.vmem [shape: f32[8,128], index: 7, kind: input, shape index: {}]   ;;  %s3196_s8 = inlined_call_operand.hbm [shape: f32[16,128], index: 8, kind: output, shape index: {}]  }
   0x1   :  { %14 = vsyncpa [#allocation8], 0  ;;  %s2468_s27 = smov [#allocation6]  }
   0x2   :  { %s32_s28 = sshll.u32 %s2468_s27, 4  ;;  %s33_s28 = int_to_ptr.vmem [resolvable:$true] %s32_s28 }
   0x3   :  { %s2432_s29 = scalar_lea.vmem %s33_s28, 12672  ;;  %p2437_p1 = scmp.lt.s32.totalorder %s33_s28, %s33_s28 }
   0x4   :  { %p2433_p0 = scmp.ne.s32.totalorder %s33_s28, %s2432_s29  ;;  %p2438_p2 = scmp.lt.s32.totalorder %s2432_s29, %s2432_s29 }
   0x6   :  { %p2439_p3 = por %p2438_p2, %p2437_p1 }
   0x8   :  { %p2440_p4 = pnand %p2439_p3, %p2433_p0 }
   0xa   :  { %2443 = shalt.err (!%p2440_p4)
}
   0xb   :  { %s2469_s30 = smov 128   ;;  %s2470_s9 = smov 8  }
   0xc   :  { %38 = dma.hbm_to_vmem [thread:$0]  %s3194_s6, 12672, %s33_s28, [#allocation7], %s2469_s30, %s2469_s30, %s2470_s9  }
   0xd   :  { %2464 = dma.done.wait [#allocation7], 12672  }
   0xe   :  { %2465 = vsyncadd [#allocation7], 4294954624  ;;  %v2471_v0 = vmov 0   ;;  %v79_v1 = vld [vmem:[%s3189_s1 + $0x10] sm:$0xff]  ;;  %v77_v2 = vld [vmem:[%s3189_s1] sm:$0xff]  ;;  %vm447_vm0 = vcmask 1043456   ;;  %v110_v25 = vlaneseq }
   0xf   :  { %2417 = vset.pattern.permute.xlu1 %v2471_v0  ;;  %2416 = vset.pattern.permute.xlu0 %v2471_v0  ;;  %v80_v3 = vld [vmem:[%s3189_s1 + $0x18] sm:$0xff]  ;;  %v78_v4 = vld [vmem:[%s3189_s1 + $0x8] sm:$0xff]  ;;  %v81_v6 = vld [vmem:[%s3189_s1 + $0x20] sm:$0xff]  ;;  %vm210_vm1 = vcmask 130048   ;;  %v2472_v29 = vmov 0.0   ;;  %s2475_s28 = smov [#allocation9]  }
  0x10   :  { %119 = vperm.xlu1 %2417, %v79_v1   ;;  %113 = vperm.xlu0 %2416, %v77_v2   ;;  %v82_v5 = vld [vmem:[%s3189_s1 + $0x28] sm:$0xff]  ;;  %v208_v8 = vld [vmem:[%s3191_s3] sm:$0xff]  ;;  %v84_v9 = vld [vmem:[%s3189_s1 + $0x38] sm:$0xff]  ;;  %v2590_v26 = vand.u32 127, %v110_v25 }
  0x11   :  { %v209_v7 = vld [vmem:[%s3191_s3 + $0x8] sm:$0xff]  ;;  %v83_v10 = vld [vmem:[%s3189_s1 + $0x30] sm:$0xff]  ;;  %v85_v12 = vld [vmem:[%s3189_s1 + $0x40] sm:$0xff] }
  0x12   :  { %2060 = vmatprep.subr.mxu0 %v209_v7  ;;  %2402 = vmatprep.subr.mxu1 %v209_v7  ;;  %v86_v11 = vld [vmem:[%s3189_s1 + $0x48] sm:$0xff]  ;;  %v88_v13 = vld [vmem:[%s3189_s1 + $0x58] sm:$0xff]  ;;  %v87_v14 = vld [vmem:[%s3189_s1 + $0x50] sm:$0xff] }
  0x13   :  { %2061 = vmatpush3.msra.mxu0 %v209_v7  ;;  %2404 = vmatpush3.msra.mxu1 %v209_v7  ;;  %v90_v15 = vld [vmem:[%s3189_s1 + $0x68] sm:$0xff]  ;;  %v89_v16 = vld [vmem:[%s3189_s1 + $0x60] sm:$0xff]  ;;  %v92_v17 = vld [vmem:[%s3189_s1 + $0x78] sm:$0xff] }
  0x14   :  { %122 = vperm.xlu1 %2417, %v80_v3   ;;  %116 = vperm.xlu0 %2416, %v78_v4   ;;  %v91_v18 = vld [vmem:[%s3189_s1 + $0x70] sm:$0xff]  ;;  %v57_v19 = vld [vmem:[#allocation6] sm:$0xff]  ;;  %v58_v20 = vld [vmem:[#allocation6 + $0x8] sm:$0xff]  ;;  %s1801_s1 = sshll.u32 %s2475_s28, 4  ;;  %s1802_s1 = int_to_ptr.vmem [resolvable:$true] %s1801_s1 }
  0x15   :  { %2062 = vmatprep.subr.mxu0 %v208_v8  ;;  %2403 = vmatprep.subr.mxu1 %v208_v8  ;;  %v412_v21 = vpack.c.bf16 %v57_v19, %v57_v19  ;;  %v421_v22 = vpack.c.bf16 %v58_v20, %v58_v20  ;;  %v1331_v23 = vld [vmem:[%s3193_s5 + $0x8] sm:$0xff]  ;;  %v1330_v24 = vld [vmem:[%s3193_s5] sm:$0xff]  ;;  %v96_v1 = vld [vmem:[%s3190_s2 + $0x10] sm:$0xff]  ;;  %s2444_s5 = scalar_lea.vmem %s1802_s1, 256  ;;  %p2449_p6 = scmp.lt.s32.totalorder %s1802_s1, %s1802_s1 }
  0x16   :  { %2063 = vmatpush3.msra.mxu0 %v208_v8  ;;  %2405 = vmatpush3.msra.mxu1 %v208_v8  ;;  %v94_v62 = vld [vmem:[%s3190_s2] sm:$0xff]  ;;  %v95_v63 = vld [vmem:[%s3190_s2 + $0x8] sm:$0xff]  ;;  %v97_v2 = vld [vmem:[%s3190_s2 + $0x18] sm:$0xff]  ;;  %p2445_p5 = scmp.ne.s32.totalorder %s1802_s1, %s2444_s5  ;;  %p2450_p7 = scmp.lt.s32.totalorder %s2444_s5, %s2444_s5 }
  0x17   :  { %2407 = vmatprep.subr.msk.bf16.mxu0 %vm447_vm0, %v412_v21  ;;  %2406 = vmatprep.subr.msk.bf16.mxu1 %vm447_vm0, %v421_v22  ;;  %v573_v34 = vsel %vm447_vm0, %v412_v21, 0  ;;  %v449_v53 = vsel %vm447_vm0, %v421_v22, 0  ;;  %v413_v0 = vpack.c.bf16 %v95_v63, %v94_v62  ;;  %v414_v3 = vpack.c.bf16 %v97_v2, %v96_v1  ;;  %v98_v4 = vld [vmem:[%s3190_s2 + $0x20] sm:$0xff]  ;;  %v100_v7 = vld [vmem:[%s3190_s2 + $0x30] sm:$0xff]  ;;  %v101_v8 = vld [vmem:[%s3190_s2 + $0x38] sm:$0xff] }
  0x18   :  { %128 = vperm.xlu1 %2417, %v82_v5   ;;  %125 = vperm.xlu0 %2416, %v81_v6   ;;  %v99_v5 = vld [vmem:[%s3190_s2 + $0x28] sm:$0xff]  ;;  %v108_v19 = vld [vmem:[%s3190_s2 + $0x70] sm:$0xff]  ;;  %v109_v20 = vld [vmem:[%s3190_s2 + $0x78] sm:$0xff]  ;;  %p2451_p8 = por %p2450_p7, %p2449_p6 }
  0x19   :  { %v415_v6 = vpack.c.bf16 %v99_v5, %v98_v4  ;;  %v420_v21 = vpack.c.bf16 %v109_v20, %v108_v19  ;;  %v73_v22 = vld [vmem:[#allocation6 + $0x80] sm:$0xff]  ;;  %v63_v63 = vld [vmem:[#allocation6 + $0x30] sm:$0xff] }
  0x1a   :  { %v61_v2 = vld [vmem:[#allocation6 + $0x20] sm:$0xff]  ;;  %v59_v5 = vld [vmem:[#allocation6 + $0x10] sm:$0xff]  ;;  %p2452_p9 = pnand %p2451_p8, %p2445_p5 }
  0x1c   :  { %134 = vperm.xlu1 %2417, %v84_v9   ;;  %131 = vperm.xlu0 %2416, %v83_v10   ;;  %v416_v9 = vpack.c.bf16 %v101_v8, %v100_v7  ;;  %v102_v10 = vld [vmem:[%s3190_s2 + $0x40] sm:$0xff] }
  0x20   :  { %140 = vperm.xlu1 %2417, %v86_v11   ;;  %137 = vperm.xlu0 %2416, %v85_v12   ;;  %v103_v11 = vld [vmem:[%s3190_s2 + $0x48] sm:$0xff] }
  0x21   :  { %v417_v12 = vpack.c.bf16 %v103_v11, %v102_v10 }
  0x24   :  { %146 = vperm.xlu1 %2417, %v88_v13   ;;  %143 = vperm.xlu0 %2416, %v87_v14   ;;  %v104_v13 = vld [vmem:[%s3190_s2 + $0x50] sm:$0xff]  ;;  %v105_v14 = vld [vmem:[%s3190_s2 + $0x58] sm:$0xff] }
  0x28   :  { %152 = vperm.xlu1 %2417, %v90_v15   ;;  %149 = vperm.xlu0 %2416, %v89_v16   ;;  %v418_v15 = vpack.c.bf16 %v105_v14, %v104_v13  ;;  %v106_v16 = vld [vmem:[%s3190_s2 + $0x60] sm:$0xff] }
  0x2c   :  { %158 = vperm.xlu1 %2417, %v92_v17   ;;  %155 = vperm.xlu0 %2416, %v91_v18   ;;  %v107_v17 = vld [vmem:[%s3190_s2 + $0x68] sm:$0xff] }
  0x2d   :  { %v419_v18 = vpack.c.bf16 %v107_v17, %v106_v16 }
  0x30   :  { %1339 = vperm.xlu1 %2417, %v1331_v23   ;;  %1334 = vperm.xlu0 %2416, %v1330_v24   ;;  %v74_v23 = vld [vmem:[#allocation6 + $0x88] sm:$0xff]  ;;  %v71_v24 = vld [vmem:[#allocation6 + $0x70] sm:$0xff] }
  0x8b   :  { %v120_v27 = vpop.permute.xlu1 %119  ;;  %v114_v28 = vpop.permute.xlu0 %113 }
  0x8c   :  { %vm160_vm2 = vcmp.eq.s32.totalorder %v2590_v26, %v114_v28  ;;  %vm162_vm3 = vcmp.eq.s32.totalorder %v2590_v26, %v120_v27  ;;  %v72_v27 = vld [vmem:[#allocation6 + $0x78] sm:$0xff] }
  0x8d   :  { %v1813_v30 = vsel %vm160_vm2, 1.0, %v2472_v29  ;;  %v1815_v33 = vsel %vm162_vm3, 1.0, %v2472_v29  ;;  %v754_v28 = vpack.c.bf16 %v72_v27, %v71_v24 }
  0x8e   :  { %2064 = vmatprep.mubr.msk.f32.mxu0 %vm210_vm1, %v1813_v30  ;;  %v69_v30 = vld [vmem:[#allocation6 + $0x60] sm:$0xff] }
  0x8f   :  { %v123_v31 = vpop.permute.xlu1 %122  ;;  %v117_v32 = vpop.permute.xlu0 %116 }
  0x90   :  { %vm161_vm4 = vcmp.eq.s32.totalorder %v2590_v26, %v117_v32  ;;  %vm163_vm5 = vcmp.eq.s32.totalorder %v2590_v26, %v123_v31  ;;  %v70_v31 = vld [vmem:[#allocation6 + $0x68] sm:$0xff] }
  0x91   :  { %v1814_v35 = vsel %vm161_vm4, 1.0, %v2472_v29  ;;  %v1816_v38 = vsel %vm163_vm5, 1.0, %v2472_v29  ;;  %vm422_vm4 = vcmask 64512   ;;  %v753_v32 = vpack.c.bf16 %v70_v31, %v69_v30 }
  0x92   :  { %2065 = vmatmul.mubr.msk.f32.vlgmr.msra.gmra.mxu0 %vm210_vm1, %v1814_v35 }
  0x93   :  { %v129_v36 = vpop.permute.xlu1 %128  ;;  %2067 = vmatprep.mubr.msk.f32.mxu0 %vm210_vm1, %v1815_v33  ;;  %v126_v37 = vpop.permute.xlu0 %125  ;;  %2107 = vmatpush3.bf16.msra.mxu0 %v573_v34  ;;  %v67_v33 = vld [vmem:[#allocation6 + $0x50] sm:$0xff]  ;;  %v68_v34 = vld [vmem:[#allocation6 + $0x58] sm:$0xff] }
  0x94   :  { %vm164_vm6 = vcmp.eq.s32.totalorder %v2590_v26, %v126_v37  ;;  %vm165_vm7 = vcmp.eq.s32.totalorder %v2590_v26, %v129_v36  ;;  %v752_v35 = vpack.c.bf16 %v68_v34, %v67_v33 }
  0x95   :  { %v1817_v39 = vsel %vm164_vm6, 1.0, %v2472_v29  ;;  %v1818_v42 = vsel %vm165_vm7, 1.0, %v2472_v29 }
  0x96   :  { %2068 = vmatmul.mubr.msk.f32.gmra.mxu0 %vm210_vm1, %v1816_v38 }
  0x97   :  { %v135_v40 = vpop.permute.xlu1 %134  ;;  %2070 = vmatprep.mubr.msk.f32.mxu0 %vm210_vm1, %v1817_v39  ;;  %v132_v41 = vpop.permute.xlu0 %131 }
  0x98   :  { %vm166_vm8 = vcmp.eq.s32.totalorder %v2590_v26, %v132_v41  ;;  %vm167_vm9 = vcmp.eq.s32.totalorder %v2590_v26, %v135_v40 }
  0x99   :  { %v1819_v43 = vsel %vm166_vm8, 1.0, %v2472_v29  ;;  %v1820_v46 = vsel %vm167_vm9, 1.0, %v2472_v29 }
  0x9a   :  { %2071 = vmatmul.mubr.msk.f32.gmra.mxu0 %vm210_vm1, %v1818_v42 }
  0x9b   :  { %v141_v44 = vpop.permute.xlu1 %140  ;;  %2073 = vmatprep.mubr.msk.f32.mxu0 %vm210_vm1, %v1819_v43  ;;  %v138_v45 = vpop.permute.xlu0 %137 }
  0x9c   :  { %vm168_vm10 = vcmp.eq.s32.totalorder %v2590_v26, %v138_v45  ;;  %vm169_vm11 = vcmp.eq.s32.totalorder %v2590_v26, %v141_v44 }
  0x9d   :  { %v1821_v47 = vsel %vm168_vm10, 1.0, %v2472_v29  ;;  %v1822_v50 = vsel %vm169_vm11, 1.0, %v2472_v29 }
  0x9e   :  { %2074 = vmatmul.mubr.msk.f32.gmra.mxu0 %vm210_vm1, %v1820_v46 }
  0x9f   :  { %v147_v48 = vpop.permute.xlu1 %146  ;;  %2076 = vmatprep.mubr.msk.f32.mxu0 %vm210_vm1, %v1821_v47  ;;  %v144_v49 = vpop.permute.xlu0 %143 }
  0xa0   :  { %vm171_vm12 = vcmp.eq.s32.totalorder %v2590_v26, %v147_v48  ;;  %vm170_vm13 = vcmp.eq.s32.totalorder %v2590_v26, %v144_v49 }
  0xa1   :  { %v1824_v51 = vsel %vm171_vm12, 1.0, %v2472_v29  ;;  %v1823_v52 = vsel %vm170_vm13, 1.0, %v2472_v29 }
  0xa2   :  { %2077 = vmatmul.mubr.msk.f32.gmra.mxu0 %vm210_vm1, %v1822_v50  ;;  %2079 = vmatprep.mubr.msk.f32.mxu1 %vm210_vm1, %v1823_v52 }
  0xa3   :  { %v153_v54 = vpop.permute.xlu1 %152  ;;  %2080 = vmatmul.mubr.msk.f32.vlgmr.msra.gmra.mxu1 %vm210_vm1, %v1824_v51  ;;  %v150_v55 = vpop.permute.xlu0 %149 }
  0xa4   :  { %vm173_vm14 = vcmp.eq.s32.totalorder %v2590_v26, %v153_v54  ;;  %vm172_vm15 = vcmp.eq.s32.totalorder %v2590_v26, %v150_v55  ;;  %2089 = vmatpush3.bf16.msra.mxu1 %v449_v53 }
  0xa5   :  { %v1826_v56 = vsel %vm173_vm14, 1.0, %v2472_v29  ;;  %v1825_v57 = vsel %vm172_vm15, 1.0, %v2472_v29 }
  0xa6   :  { %2082 = vmatprep.mubr.msk.f32.mxu1 %vm210_vm1, %v1825_v57 }
  0xa7   :  { %v159_v58 = vpop.permute.xlu1 %158  ;;  %2083 = vmatmul.mubr.msk.f32.gmra.mxu1 %vm210_vm1, %v1826_v56  ;;  %v156_v59 = vpop.permute.xlu0 %155 }
  0xa8   :  { %vm175_vm2 = vcmp.eq.s32.totalorder %v2590_v26, %v159_v58  ;;  %vm174_vm3 = vcmp.eq.s32.totalorder %v2590_v26, %v156_v59  ;;  %v755_v26 = vpack.c.bf16 %v74_v23, %v73_v22 }
  0xa9   :  { %v1828_v60 = vsel %vm175_vm2, 1.0, %v2472_v29  ;;  %v1827_v61 = vsel %vm174_vm3, 1.0, %v2472_v29 }
  0xaa   :  { %2085 = vmatprep.mubr.msk.f32.mxu1 %vm210_vm1, %v1827_v61  ;;  %2124 = vmatprep.subr.bf16.mxu1 %v755_v26  ;;  %v66_v61 = vld [vmem:[#allocation6 + $0x48] sm:$0xff] }
  0xab   :  { %2086 = vmatmul.mubr.msk.f32.gmra.mxu1 %vm210_vm1, %v1828_v60  ;;  %v65_v60 = vld [vmem:[#allocation6 + $0x40] sm:$0xff] }
  0xac   :  { %2090 = vmatprep.mubr.msk.bf16.mxu1 %vm422_vm4, %v413_v0  ;;  %v751_v62 = vpack.c.bf16 %v66_v61, %v65_v60  ;;  %v64_v0 = vld [vmem:[#allocation6 + $0x38] sm:$0xff] }
  0xad   :  { %v750_v1 = vpack.c.bf16 %v64_v0, %v63_v63 }
  0xaf   :  { %2091 = vmatmul.mubr.msk.bf16.vlgmr.msra.gmra.mxu1 %vm422_vm4, %v414_v3  ;;  %v62_v3 = vld [vmem:[#allocation6 + $0x28] sm:$0xff] }
  0xb0   :  { %2094 = vmatprep.mubr.msk.bf16.mxu1 %vm422_vm4, %v415_v6  ;;  %2125 = vmatpush3.bf16.msra.mxu1 %v755_v26  ;;  %v749_v4 = vpack.c.bf16 %v62_v3, %v61_v2  ;;  %v60_v6 = vld [vmem:[#allocation6 + $0x18] sm:$0xff] }
  0xb1   :  { %2126 = vmatprep.subr.bf16.mxu1 %v754_v28  ;;  %v748_v7 = vpack.c.bf16 %v60_v6, %v59_v5 }
  0xb4   :  { %2127 = vmatpush3.bf16.msra.mxu1 %v754_v28 }
  0xb5   :  { %2128 = vmatprep.subr.bf16.mxu1 %v753_v32 }
  0xb7   :  { %2095 = vmatmul.mubr.msk.bf16.gmra.mxu1 %vm422_vm4, %v416_v9 }
  0xb8   :  { %2098 = vmatprep.mubr.msk.bf16.mxu1 %vm422_vm4, %v417_v12  ;;  %2129 = vmatpush3.bf16.msra.mxu1 %v753_v32 }
  0xb9   :  { %2130 = vmatprep.subr.bf16.mxu1 %v752_v35 }
  0xbc   :  { %2131 = vmatpush3.bf16.msra.mxu1 %v752_v35 }
  0xbd   :  { %2132 = vmatprep.subr.bf16.mxu1 %v751_v62 }
  0xbf   :  { %2099 = vmatmul.mubr.msk.bf16.gmra.mxu1 %vm422_vm4, %v418_v15 }
  0xc0   :  { %2102 = vmatprep.mubr.msk.bf16.mxu1 %vm422_vm4, %v419_v18  ;;  %2133 = vmatpush3.bf16.msra.mxu1 %v751_v62 }
  0xc1   :  { %2134 = vmatprep.subr.bf16.mxu1 %v750_v1 }
  0xc4   :  { %2135 = vmatpush3.bf16.msra.mxu1 %v750_v1 }
  0xc5   :  { %2136 = vmatprep.subr.bf16.mxu1 %v749_v4 }
  0xc7   :  { %2103 = vmatmul.mubr.msk.bf16.gmra.mxu1 %vm422_vm4, %v420_v21  ;;  %v2709_v21 = vld [vmem:[%s3195_s7] ss:$0 sm:$0xff] }
  0xc8   :  { %2137 = vmatpush3.bf16.msra.mxu1 %v749_v4 }
  0xc9   :  { %2138 = vmatprep.subr.bf16.mxu1 %v748_v7 }
  0xcc   :  { %2139 = vmatpush3.bf16.msra.mxu1 %v748_v7 }
 0x152   :  { %v2066_v36 = vpop.f32.mrf.mxu0 }
 0x154   :  { %v325_v37 = vpop.f32.mrf.mxu0 }
 0x155   :  { %v404_v38 = vpack.c.bf16 %v2066_v36, %v325_v37 }
 0x156   :  { %v2069_v39 = vpop.f32.mrf.mxu0 }
 0x157   :  { %2108 = vmatprep.mubr.msk.bf16.mxu0 %vm422_vm4, %v404_v38 }
 0x158   :  { %v335_v40 = vpop.f32.mrf.mxu0 }
 0x159   :  { %v405_v41 = vpack.c.bf16 %v2069_v39, %v335_v40 }
 0x15a   :  { %v2072_v42 = vpop.f32.mrf.mxu0 }
 0x15b   :  { %2109 = vmatmul.mubr.msk.bf16.vlgmr.msra.gmra.mxu0 %vm422_vm4, %v405_v41 }
 0x15c   :  { %v345_v43 = vpop.f32.mrf.mxu0 }
 0x15d   :  { %v406_v44 = vpack.c.bf16 %v2072_v42, %v345_v43 }
 0x15e   :  { %v2075_v45 = vpop.f32.mrf.mxu0 }
 0x15f   :  { %2112 = vmatprep.mubr.msk.bf16.mxu0 %vm422_vm4, %v406_v44 }
 0x160   :  { %v355_v46 = vpop.f32.mrf.mxu0 }
 0x161   :  { %v407_v47 = vpack.c.bf16 %v2075_v45, %v355_v46 }
 0x162   :  { %v2078_v48 = vpop.f32.mrf.mxu0 }
 0x163   :  { %v2081_v49 = vpop.f32.mrf.mxu1  ;;  %2113 = vmatmul.mubr.msk.bf16.gmra.mxu0 %vm422_vm4, %v407_v47 }
 0x164   :  { %v365_v50 = vpop.f32.mrf.mxu0 }
 0x165   :  { %v408_v51 = vpack.c.bf16 %v2078_v48, %v365_v50  ;;  %v375_v52 = vpop.f32.mrf.mxu1 }
 0x166   :  { %v409_v54 = vpack.c.bf16 %v2081_v49, %v375_v52 }
 0x167   :  { %v2084_v53 = vpop.f32.mrf.mxu1  ;;  %2116 = vmatprep.mubr.msk.bf16.mxu0 %vm422_vm4, %v408_v51 }
 0x169   :  { %v385_v55 = vpop.f32.mrf.mxu1 }
 0x16a   :  { %v410_v56 = vpack.c.bf16 %v2084_v53, %v385_v55 }
 0x16b   :  { %v2087_v57 = vpop.f32.mrf.mxu1  ;;  %2117 = vmatmul.mubr.msk.bf16.gmra.mxu0 %vm422_vm4, %v409_v54 }
 0x16c   :  { %2120 = vmatprep.mubr.msk.bf16.mxu0 %vm422_vm4, %v410_v56 }
 0x16d   :  { %v395_v58 = vpop.f32.mrf.mxu1 }
 0x16e   :  { %v411_v59 = vpack.c.bf16 %v2087_v57, %v395_v58 }
 0x16f   :  { %v2092_v8 = vpop.f32.mrf.mxu1 }
 0x171   :  { %v485_v9 = vpop.f32.mrf.mxu1 }
 0x173   :  { %2121 = vmatmul.mubr.msk.bf16.gmra.mxu0 %vm422_vm4, %v411_v59  ;;  %v2093_v10 = vpop.f32.mrf.mxu1 }
 0x175   :  { %v488_v11 = vpop.f32.mrf.mxu1 }
 0x177   :  { %v2096_v12 = vpop.f32.mrf.mxu1 }
 0x179   :  { %v501_v13 = vpop.f32.mrf.mxu1 }
 0x17b   :  { %v2097_v14 = vpop.f32.mrf.mxu1 }
 0x17d   :  { %v504_v15 = vpop.f32.mrf.mxu1 }
 0x17f   :  { %v2100_v18 = vpop.f32.mrf.mxu1 }
 0x181   :  { %v517_v26 = vpop.f32.mrf.mxu1 }
 0x183   :  { %v2101_v36 = vpop.f32.mrf.mxu1 }
 0x185   :  { %v520_v47 = vpop.f32.mrf.mxu1 }
 0x187   :  { %v2104_v60 = vpop.f32.mrf.mxu1 }
 0x189   :  { %v533_v5 = vpop.f32.mrf.mxu1 }
 0x21b   :  { %v2110_v16 = vpop.f32.mrf.mxu0 }
 0x21c   :  { %v618_v19 = vadd.f32 %v2110_v16, %v2092_v8 }
 0x21d   :  { %v609_v17 = vpop.f32.mrf.mxu0 }
 0x21e   :  { %v610_v20 = vadd.f32 %v609_v17, %v485_v9  ;;  %v678_v27 = vadd.f32 %v2709_v21, %v618_v19 }
 0x21f   :  { %v2111_v22 = vpop.f32.mrf.mxu0 }
 0x220   :  { %v621_v23 = vadd.f32 %v2111_v22, %v2093_v10  ;;  %v676_v28 = vadd.f32 %v2709_v21, %v610_v20  ;;  %v710_v37 = vmul.f32 0.1, %v678_v27  ;;  %vm694_vm7 = vcmp.ge.f32.partialorder %v678_v27, 0.0  ;;  %v2105_v20 = vpop.f32.mrf.mxu1 }
 0x221   :  { %v612_v24 = vpop.f32.mrf.mxu0 }
 0x222   :  { %v679_v30 = vadd.f32 %v2709_v21, %v621_v23  ;;  %v613_v31 = vadd.f32 %v612_v24, %v488_v11  ;;  %v708_v38 = vmul.f32 0.1, %v676_v28  ;;  %vm692_vm5 = vcmp.ge.f32.partialorder %v676_v28, 0.0 }
 0x223   :  { %v2114_v32 = vpop.f32.mrf.mxu0  ;;  %v726_v52 = vsel %vm694_vm7, %v678_v27, %v710_v37 }
 0x224   :  { %v711_v33 = vmul.f32 0.1, %v679_v30  ;;  %v677_v34 = vadd.f32 %v2709_v21, %v613_v31  ;;  %vm695_vm1 = vcmp.ge.f32.partialorder %v679_v30, 0.0  ;;  %v634_v41 = vadd.f32 %v2114_v32, %v2096_v12  ;;  %v536_v32 = vpop.f32.mrf.mxu1 }
 0x225   :  { %v625_v35 = vpop.f32.mrf.mxu0  ;;  %v724_v51 = vsel %vm692_vm5, %v676_v28, %v708_v38 }
 0x226   :  { %v626_v39 = vadd.f32 %v625_v35, %v501_v13  ;;  %vm693_vm6 = vcmp.ge.f32.partialorder %v677_v34, 0.0  ;;  %v709_v40 = vmul.f32 0.1, %v677_v34  ;;  %v727_v44 = vsel %vm695_vm1, %v679_v30, %v711_v33 }
 0x227   :  { %v2115_v42 = vpop.f32.mrf.mxu0  ;;  %v682_v53 = vadd.f32 %v2709_v21, %v634_v41  ;;  %v741_v56 = vpack.c.bf16 %v727_v44, %v726_v52 }
 0x228   :  { %v637_v43 = vadd.f32 %v2115_v42, %v2097_v14  ;;  %v680_v45 = vadd.f32 %v2709_v21, %v626_v39  ;;  %v725_v48 = vsel %vm693_vm6, %v677_v34, %v709_v40 }
 0x229   :  { %v628_v46 = vpop.f32.mrf.mxu0  ;;  %v740_v55 = vpack.c.bf16 %v725_v48, %v724_v51  ;;  %v714_v0 = vmul.f32 0.1, %v682_v53  ;;  %vm698_vm11 = vcmp.ge.f32.partialorder %v682_v53, 0.0 }
 0x22a   :  { %v683_v49 = vadd.f32 %v2709_v21, %v637_v43  ;;  %v629_v50 = vadd.f32 %v628_v46, %v504_v15  ;;  %v712_v58 = vmul.f32 0.1, %v680_v45  ;;  %vm696_vm10 = vcmp.ge.f32.partialorder %v680_v45, 0.0 }
 0x22b   :  { %v2118_v54 = vpop.f32.mrf.mxu0  ;;  %2140 = vmatprep.mubr.bf16.mxu1 %v740_v55  ;;  %v730_v15 = vsel %vm698_vm11, %v682_v53, %v714_v0 }
 0x22c   :  { %v681_v57 = vadd.f32 %v2709_v21, %v629_v50  ;;  %v715_v59 = vmul.f32 0.1, %v683_v49  ;;  %vm699_vm8 = vcmp.ge.f32.partialorder %v683_v49, 0.0  ;;  %2141 = vmatmul.mubr.bf16.vlgmr.msra.gmra.mxu1 %v741_v56  ;;  %v650_v1 = vadd.f32 %v2118_v54, %v2100_v18  ;;  %v2733_v54 = vld [vmem:[%s3188_s0] ss:$0 sm:$0xff] }
 0x22d   :  { %v641_v61 = vpop.f32.mrf.mxu0  ;;  %v728_v11 = vsel %vm696_vm10, %v680_v45, %v712_v58  ;;  %v2473_v56 = vmov 1.0  }
 0x22e   :  { %vm697_vm9 = vcmp.ge.f32.partialorder %v681_v57, 0.0  ;;  %v713_v62 = vmul.f32 0.1, %v681_v57  ;;  %v642_v63 = vadd.f32 %v641_v61, %v517_v26  ;;  %v731_v8 = vsel %vm699_vm8, %v683_v49, %v715_v59 }
 0x22f   :  { %v2119_v2 = vpop.f32.mrf.mxu0  ;;  %v686_v12 = vadd.f32 %v2709_v21, %v650_v1  ;;  %v743_v17 = vpack.c.bf16 %v731_v8, %v730_v15  ;;  %vm2474_vm8 = vmmov 0  }
 0x230   :  { %v653_v3 = vadd.f32 %v2119_v2, %v2101_v36  ;;  %v684_v4 = vadd.f32 %v2709_v21, %v642_v63  ;;  %v729_v7 = vsel %vm697_vm9, %v681_v57, %v713_v62 }
 0x231   :  { %v644_v6 = vpop.f32.mrf.mxu0  ;;  %v742_v14 = vpack.c.bf16 %v729_v7, %v728_v11  ;;  %v718_v26 = vmul.f32 0.1, %v686_v12  ;;  %vm702_vm15 = vcmp.ge.f32.partialorder %v686_v12, 0.0 }
 0x232   :  { %v687_v9 = vadd.f32 %v2709_v21, %v653_v3  ;;  %v645_v10 = vadd.f32 %v644_v6, %v520_v47  ;;  %v716_v18 = vmul.f32 0.1, %v684_v4  ;;  %vm700_vm14 = vcmp.ge.f32.partialorder %v684_v4, 0.0  ;;  %v2763_v6 = vld [vmem:[%s3195_s7 + $0x1] ss:$0 sm:$0xff] }
 0x233   :  { %v2122_v13 = vpop.f32.mrf.mxu0  ;;  %2144 = vmatprep.mubr.bf16.mxu1 %v742_v14  ;;  %v734_v41 = vsel %vm702_vm15, %v686_v12, %v718_v26 }
 0x234   :  { %v685_v16 = vadd.f32 %v2709_v21, %v645_v10  ;;  %v719_v19 = vmul.f32 0.1, %v687_v9  ;;  %vm703_vm12 = vcmp.ge.f32.partialorder %v687_v9, 0.0  ;;  %2145 = vmatmul.mubr.bf16.gmra.mxu1 %v743_v17  ;;  %v666_v27 = vadd.f32 %v2122_v13, %v2104_v60 }
 0x235   :  { %v657_v22 = vpop.f32.mrf.mxu0  ;;  %v732_v38 = vsel %vm700_vm14, %v684_v4, %v716_v18 }
 0x236   :  { %vm701_vm13 = vcmp.ge.f32.partialorder %v685_v16, 0.0  ;;  %v717_v23 = vmul.f32 0.1, %v685_v16  ;;  %v658_v24 = vadd.f32 %v657_v22, %v533_v5  ;;  %v735_v35 = vsel %vm703_vm12, %v687_v9, %v719_v19 }
 0x237   :  { %v2123_v28 = vpop.f32.mrf.mxu0  ;;  %v690_v39 = vadd.f32 %v2709_v21, %v666_v27  ;;  %v745_v44 = vpack.c.bf16 %v735_v35, %v734_v41 }
 0x238   :  { %v688_v30 = vadd.f32 %v2709_v21, %v658_v24  ;;  %v669_v31 = vadd.f32 %v2123_v28, %v2105_v20  ;;  %v733_v34 = vsel %vm701_vm13, %v685_v16, %v717_v23 }
 0x239   :  { %v660_v33 = vpop.f32.mrf.mxu0  ;;  %v744_v40 = vpack.c.bf16 %v733_v34, %v732_v38  ;;  %v722_v47 = vmul.f32 0.1, %v690_v39  ;;  %vm706_vm5 = vcmp.ge.f32.partialorder %v690_v39, 0.0 }
 0x23a   :  { %v691_v36 = vadd.f32 %v2709_v21, %v669_v31  ;;  %v661_v37 = vadd.f32 %v660_v33, %v536_v32  ;;  %v720_v42 = vmul.f32 0.1, %v688_v30  ;;  %vm704_vm2 = vcmp.ge.f32.partialorder %v688_v30, 0.0 }
 0x23b   :  { %2148 = vmatprep.mubr.bf16.mxu1 %v744_v40  ;;  %v738_v52 = vsel %vm706_vm5, %v690_v39, %v722_v47 }
 0x23c   :  { %v689_v43 = vadd.f32 %v2709_v21, %v661_v37  ;;  %v723_v45 = vmul.f32 0.1, %v691_v36  ;;  %vm707_vm3 = vcmp.ge.f32.partialorder %v691_v36, 0.0  ;;  %2149 = vmatmul.mubr.bf16.gmra.mxu1 %v745_v44  ;;  %v736_v48 = vsel %vm704_vm2, %v688_v30, %v720_v42 }
 0x23d   :  { %v2728_v21 = vshrl.u32 %v110_v25, 7 }
 0x23e   :  { %vm705_vm1 = vcmp.ge.f32.partialorder %v689_v43, 0.0  ;;  %v721_v46 = vmul.f32 0.1, %v689_v43  ;;  %v739_v51 = vsel %vm707_vm3, %v691_v36, %v723_v45 }
 0x23f   :  { %v747_v53 = vpack.c.bf16 %v739_v51, %v738_v52  ;;  %v2736_v55 = vadd.s32 8, %v2728_v21  ;;  %vm864_vm6 = vcmp.eq.s32.totalorder %v2728_v21, %v2733_v54 }
 0x240   :  { %v737_v49 = vsel %vm705_vm1, %v689_v43, %v721_v46  ;;  %2188 = vmatprep.mubr.msk.f32.mxu0 %vm864_vm6, %v2473_v56 }
 0x241   :  { %v746_v50 = vpack.c.bf16 %v737_v49, %v736_v48  ;;  %vm865_vm7 = vcmp.eq.s32.totalorder %v2736_v55, %v2733_v54  ;;  %v1254_v55 = vld [vmem:[#allocation6 + $0xd8] sm:$0xff] }
 0x243   :  { %2152 = vmatprep.mubr.bf16.mxu1 %v746_v50 }
 0x244   :  { %2153 = vmatmul.mubr.bf16.gmra.mxu1 %v747_v53 }
 0x245   :  { %2223 = vmatprep.mubr.msk.f32.mxu1 %vm864_vm6, %v2473_v56 }
 0x2ec   :  { %v2750_v25 = vpop.f32.mrf.mxu1 }
 0x2ed   :  { %v2894_v36 = vadd.f32 %v2750_v25, %v2763_v6 }
 0x2ee   :  { %v2752_v57 = vpop.f32.mrf.mxu1 }
 0x2ef   :  { %v2918_v40 = vadd.f32 %v2763_v6, %v2752_v57  ;;  %v2924_v41 = vmul.f32 %v2894_v36, %v2894_v36 }
 0x2f0   :  { %v2754_v58 = vpop.f32.mrf.mxu1 }
 0x2f1   :  { %v2882_v34 = vadd.f32 %v2754_v58, %v2763_v6  ;;  %v2940_v43 = vmul.f32 %v2918_v40, %v2918_v40 }
 0x2f2   :  { %v2756_v59 = vpop.f32.mrf.mxu1 }
 0x2f3   :  { %v2906_v38 = vadd.f32 %v2763_v6, %v2756_v59  ;;  %v2912_v39 = vmul.f32 %v2882_v34, %v2882_v34 }
 0x2f4   :  { %v2146_v60 = vpop.f32.mrf.mxu1 }
 0x2f5   :  { %v2847_v27 = vadd.f32 %v2146_v60, %v2763_v6  ;;  %v2932_v42 = vmul.f32 %v2906_v38, %v2906_v38 }
 0x2f6   :  { %v2758_v61 = vpop.f32.mrf.mxu1 }
 0x2f7   :  { %v2870_v32 = vadd.f32 %v2763_v6, %v2758_v61  ;;  %v2876_v33 = vmul.f32 %v2847_v27, %v2847_v27 }
 0x2f8   :  { %v2147_v62 = vpop.f32.mrf.mxu1 }
 0x2f9   :  { %v2836_v24 = vadd.f32 %v2147_v62, %v2763_v6  ;;  %v2900_v37 = vmul.f32 %v2870_v32, %v2870_v32 }
 0x2fa   :  { %v813_v63 = vpop.f32.mrf.mxu1 }
 0x2fb   :  { %v2858_v30 = vadd.f32 %v2763_v6, %v813_v63  ;;  %v2864_v31 = vmul.f32 %v2836_v24, %v2836_v24  ;;  %v1056_v63 = vmul.f32 %v2876_v33, %v2847_v27 }
 0x2fc   :  { %v2150_v0 = vpop.f32.mrf.mxu1 }
 0x2fd   :  { %v2803_v17 = vadd.f32 %v2150_v0, %v2763_v6  ;;  %v2888_v35 = vmul.f32 %v2858_v30, %v2858_v30  ;;  %v1057_v61 = vmul.f32 %v2864_v31, %v2836_v24  ;;  %v1154_v0 = vmul.f32 %v2864_v31, %v2864_v31 }
 0x2fe   :  { %v826_v1 = vpop.f32.mrf.mxu1 }
 0x2ff   :  { %v2825_v22 = vadd.f32 %v2763_v6, %v826_v1  ;;  %v2831_v23 = vmul.f32 %v2803_v17, %v2803_v17  ;;  %v1055_v1 = vmul.f32 %v2888_v35, %v2858_v30 }
 0x300   :  { %v2151_v2 = vpop.f32.mrf.mxu1 }
 0x301   :  { %v2792_v15 = vadd.f32 %v2151_v2, %v2763_v6  ;;  %v2853_v28 = vmul.f32 %v2825_v22, %v2825_v22  ;;  %v1060_v53 = vmul.f32 %v2831_v23, %v2803_v17  ;;  %v1157_v58 = vmul.f32 %v2831_v23, %v2831_v23 }
 0x302   :  { %v829_v3 = vpop.f32.mrf.mxu1  ;;  %v1153_v2 = vmul.f32 %v2876_v33, %v2876_v33 }
 0x303   :  { %v2814_v19 = vadd.f32 %v2763_v6, %v829_v3  ;;  %v2820_v20 = vmul.f32 %v2792_v15, %v2792_v15  ;;  %v1058_v59 = vmul.f32 %v2853_v28, %v2825_v22  ;;  %v1155_v62 = vmul.f32 %v2853_v28, %v2853_v28 }
 0x304   :  { %v2154_v4 = vpop.f32.mrf.mxu1  ;;  %v1054_v3 = vmul.f32 %v2900_v37, %v2870_v32 }
 0x305   :  { %v2766_v8 = vadd.f32 %v2154_v4, %v2763_v6  ;;  %v2842_v26 = vmul.f32 %v2814_v19, %v2814_v19  ;;  %v1061_v51 = vmul.f32 %v2820_v20, %v2792_v15  ;;  %v1158_v25 = vmul.f32 %v2820_v20, %v2820_v20 }
 0x306   :  { %v842_v5 = vpop.f32.mrf.mxu1  ;;  %v1152_v4 = vmul.f32 %v2888_v35, %v2888_v35 }
 0x307   :  { %v2781_v13 = vadd.f32 %v2763_v6, %v842_v5  ;;  %v2787_v14 = vmul.f32 %v2766_v8, %v2766_v8  ;;  %v1059_v57 = vmul.f32 %v2842_v26, %v2814_v19  ;;  %v1156_v60 = vmul.f32 %v2842_v26, %v2842_v26 }
 0x308   :  { %v2155_v7 = vpop.f32.mrf.mxu1  ;;  %v1053_v5 = vmul.f32 %v2912_v39, %v2882_v34 }
 0x309   :  { %v2769_v9 = vadd.f32 %v2155_v7, %v2763_v6  ;;  %v2809_v18 = vmul.f32 %v2781_v13, %v2781_v13  ;;  %v1064_v45 = vmul.f32 %v2787_v14, %v2766_v8  ;;  %v1161_v48 = vmul.f32 %v2787_v14, %v2787_v14 }
 0x30a   :  { %v845_v10 = vpop.f32.mrf.mxu1  ;;  %v1052_v7 = vmul.f32 %v2924_v41, %v2894_v36 }
 0x30b   :  { %v2772_v11 = vadd.f32 %v2763_v6, %v845_v10  ;;  %2156 = vmatprep.subr.mxu0 %v2769_v9  ;;  %v2777_v12 = vmul.f32 %v2769_v9, %v2769_v9  ;;  %v1062_v49 = vmul.f32 %v2809_v18, %v2781_v13  ;;  %v1159_v52 = vmul.f32 %v2809_v18, %v2809_v18 }
 0x30c   :  { %2157 = vmatpush3.msra.mxu0 %v2769_v9  ;;  %v1151_v6 = vmul.f32 %v2900_v37, %v2900_v37  ;;  %v1149_v10 = vmul.f32 %v2924_v41, %v2924_v41 }
 0x30d   :  { %2158 = vmatprep.subr.mxu0 %v2766_v8  ;;  %2191 = vmatprep.subr.mxu1 %v2777_v12  ;;  %v2798_v16 = vmul.f32 %v2772_v11, %v2772_v11  ;;  %v1065_v44 = vmul.f32 %v2777_v12, %v2769_v9  ;;  %v1162_v46 = vmul.f32 %v2777_v12, %v2777_v12 }
 0x30e   :  { %2159 = vmatpush3.msra.mxu0 %v2766_v8  ;;  %2192 = vmatpush3.msra.mxu1 %v2777_v12  ;;  %v1150_v8 = vmul.f32 %v2912_v39, %v2912_v39  ;;  %v1051_v9 = vmul.f32 %v2932_v42, %v2906_v38  ;;  %v1050_v12 = vmul.f32 %v2940_v43, %v2918_v40 }
 0x30f   :  { %2160 = vmatprep.subr.mxu0 %v2772_v11  ;;  %2193 = vmatprep.subr.mxu1 %v2787_v14  ;;  %v1063_v47 = vmul.f32 %v2798_v16, %v2772_v11  ;;  %v1160_v50 = vmul.f32 %v2798_v16, %v2798_v16 }
 0x310   :  { %2161 = vmatpush3.msra.mxu0 %v2772_v11  ;;  %2194 = vmatpush3.msra.mxu1 %v2787_v14  ;;  %v1245_v11 = vld [vmem:[#allocation6 + $0x90] sm:$0xff]  ;;  %v1260_v14 = vld [vmem:[#allocation6 + $0x108] sm:$0xff] }
 0x311   :  { %2162 = vmatprep.subr.mxu0 %v2781_v13  ;;  %2195 = vmatprep.subr.mxu1 %v2798_v16 }
 0x312   :  { %2163 = vmatpush3.msra.mxu0 %v2781_v13  ;;  %2196 = vmatpush3.msra.mxu1 %v2798_v16  ;;  %v1148_v13 = vmul.f32 %v2932_v42, %v2932_v42  ;;  %v1437_v16 = vpack.c.bf16 %v1245_v11, %v1245_v11  ;;  %v1292_v11 = vld [vmem:[#allocation6 + $0x208] sm:$0xff] }
 0x313   :  { %2164 = vmatprep.subr.mxu0 %v2792_v15  ;;  %2197 = vmatprep.subr.mxu1 %v2809_v18 }
 0x314   :  { %2165 = vmatpush3.msra.mxu0 %v2792_v15  ;;  %2198 = vmatpush3.msra.mxu1 %v2809_v18  ;;  %v1261_v15 = vld [vmem:[#allocation6 + $0x110] sm:$0xff] }
 0x315   :  { %2166 = vmatprep.subr.mxu0 %v2803_v17  ;;  %2199 = vmatprep.subr.mxu1 %v2820_v20  ;;  %v1446_v18 = vpack.c.bf16 %v1261_v15, %v1260_v14 }
 0x316   :  { %2167 = vmatpush3.msra.mxu0 %v2803_v17  ;;  %2200 = vmatpush3.msra.mxu1 %v2820_v20  ;;  %v1147_v17 = vmul.f32 %v2940_v43, %v2940_v43  ;;  %v1259_v20 = vld [vmem:[#allocation6 + $0x100] sm:$0xff] }
 0x317   :  { %2168 = vmatprep.subr.mxu0 %v2814_v19  ;;  %2201 = vmatprep.subr.mxu1 %v2831_v23 }
 0x318   :  { %2169 = vmatpush3.msra.mxu0 %v2814_v19  ;;  %2202 = vmatpush3.msra.mxu1 %v2831_v23  ;;  %v1258_v19 = vld [vmem:[#allocation6 + $0xf8] sm:$0xff]  ;;  %v1435_v23 = vld [vmem:[%s3192_s4 + $0x8] sm:$0xff] }
 0x319   :  { %2170 = vmatprep.subr.mxu0 %v2825_v22  ;;  %2203 = vmatprep.subr.mxu1 %v2842_v26  ;;  %v1445_v21 = vpack.c.bf16 %v1259_v20, %v1258_v19 }
 0x31a   :  { %2171 = vmatpush3.msra.mxu0 %v2825_v22  ;;  %2204 = vmatpush3.msra.mxu1 %v2842_v26  ;;  %v1434_v22 = vld [vmem:[%s3192_s4] sm:$0xff]  ;;  %v1256_v26 = vld [vmem:[#allocation6 + $0xe8] sm:$0xff] }
 0x31b   :  { %2172 = vmatprep.subr.mxu0 %v2836_v24  ;;  %2205 = vmatprep.subr.mxu1 %v2853_v28 }
 0x31c   :  { %2173 = vmatpush3.msra.mxu0 %v2836_v24  ;;  %2206 = vmatpush3.msra.mxu1 %v2853_v28  ;;  %v1492_v24 = vsel %vm447_vm0, %v1437_v16, 0  ;;  %v1436_v28 = vpack.c.bf16 %v1435_v23, %v1434_v22  ;;  %v1290_v23 = vld [vmem:[#allocation6 + $0x1f8] sm:$0xff] }
 0x31d   :  { %2174 = vmatprep.subr.mxu0 %v2847_v27  ;;  %2207 = vmatprep.subr.mxu1 %v2864_v31 }
 0x31e   :  { %2175 = vmatpush3.msra.mxu0 %v2847_v27  ;;  %2208 = vmatpush3.msra.mxu1 %v2864_v31  ;;  %v1257_v27 = vld [vmem:[#allocation6 + $0xf0] sm:$0xff]  ;;  %v1252_v31 = vld [vmem:[#allocation6 + $0xc8] sm:$0xff] }
 0x31f   :  { %2176 = vmatprep.subr.mxu0 %v2858_v30  ;;  %2209 = vmatprep.subr.mxu1 %v2876_v33  ;;  %v1444_v54 = vpack.c.bf16 %v1257_v27, %v1256_v26 }
 0x320   :  { %2177 = vmatpush3.msra.mxu0 %v2858_v30  ;;  %2210 = vmatpush3.msra.mxu1 %v2876_v33 }
 0x321   :  { %2178 = vmatprep.subr.mxu0 %v2870_v32  ;;  %2211 = vmatprep.subr.mxu1 %v2888_v35 }
 0x322   :  { %2179 = vmatpush3.msra.mxu0 %v2870_v32  ;;  %2212 = vmatpush3.msra.mxu1 %v2888_v35  ;;  %v1253_v32 = vld [vmem:[#allocation6 + $0xd0] sm:$0xff]  ;;  %v1251_v35 = vld [vmem:[#allocation6 + $0xc0] sm:$0xff] }
 0x323   :  { %2180 = vmatprep.subr.mxu0 %v2882_v34  ;;  %2213 = vmatprep.subr.mxu1 %v2900_v37  ;;  %v1442_v33 = vpack.c.bf16 %v1253_v32, %v1252_v31 }
 0x324   :  { %2181 = vmatpush3.msra.mxu0 %v2882_v34  ;;  %2214 = vmatpush3.msra.mxu1 %v2900_v37  ;;  %v1250_v34 = vld [vmem:[#allocation6 + $0xb8] sm:$0xff]  ;;  %v1248_v37 = vld [vmem:[#allocation6 + $0xa8] sm:$0xff] }
 0x325   :  { %2182 = vmatprep.subr.mxu0 %v2894_v36  ;;  %2215 = vmatprep.subr.mxu1 %v2912_v39 }
 0x326   :  { %2183 = vmatpush3.msra.mxu0 %v2894_v36  ;;  %2216 = vmatpush3.msra.mxu1 %v2912_v39  ;;  %v1441_v36 = vpack.c.bf16 %v1251_v35, %v1250_v34  ;;  %v1286_v34 = vld [vmem:[#allocation6 + $0x1d8] sm:$0xff]  ;;  %v1287_v35 = vld [vmem:[#allocation6 + $0x1e0] sm:$0xff] }
 0x327   :  { %2184 = vmatprep.subr.mxu0 %v2906_v38  ;;  %2217 = vmatprep.subr.mxu1 %v2924_v41 }
 0x328   :  { %2185 = vmatpush3.msra.mxu0 %v2906_v38  ;;  %2218 = vmatpush3.msra.mxu1 %v2924_v41  ;;  %v1249_v38 = vld [vmem:[#allocation6 + $0xb0] sm:$0xff] }
 0x329   :  { %2186 = vmatprep.subr.mxu0 %v2918_v40  ;;  %2219 = vmatprep.subr.mxu1 %v2932_v42  ;;  %v1440_v39 = vpack.c.bf16 %v1249_v38, %v1248_v37  ;;  %v1277_v41 = vld [vmem:[#allocation6 + $0x190] sm:$0xff]  ;;  %v1284_v37 = vld [vmem:[#allocation6 + $0x1c8] sm:$0xff] }
 0x32a   :  { %2187 = vmatpush3.msra.mxu0 %v2918_v40  ;;  %2220 = vmatpush3.msra.mxu1 %v2932_v42  ;;  %v1276_v40 = vld [vmem:[#allocation6 + $0x188] sm:$0xff]  ;;  %v1285_v38 = vld [vmem:[#allocation6 + $0x1d0] sm:$0xff] }
 0x32b   :  { %2189 = vmatmul.mubr.msk.f32.vlgmr.msra.gmra.mxu0 %vm865_vm7, %v2473_v56  ;;  %2221 = vmatprep.subr.mxu1 %v2940_v43  ;;  %v1543_v42 = vpack.c.bf16 %v1277_v41, %v1276_v40  ;;  %v1282_v40 = vld [vmem:[#allocation6 + $0x1b8] sm:$0xff]  ;;  %v1283_v41 = vld [vmem:[#allocation6 + $0x1c0] sm:$0xff] }
 0x32c   :  { %2226 = vmatprep.subr.mxu0 %v1065_v44  ;;  %2222 = vmatpush3.msra.mxu1 %v2940_v43  ;;  %v1246_v43 = vld [vmem:[#allocation6 + $0x98] sm:$0xff] }
 0x32d   :  { %2227 = vmatpush3.msra.mxu0 %v1065_v44  ;;  %2224 = vmatmul.mubr.msk.f32.vlgmr.msra.gmra.mxu1 %vm865_vm7, %v2473_v56  ;;  %v1247_v44 = vld [vmem:[#allocation6 + $0xa0] sm:$0xff] }
 0x32e   :  { %2228 = vmatprep.subr.mxu0 %v1064_v45  ;;  %2261 = vmatprep.subr.mxu1 %v1162_v46 }
 0x32f   :  { %2229 = vmatpush3.msra.mxu0 %v1064_v45  ;;  %2262 = vmatpush3.msra.mxu1 %v1162_v46  ;;  %v1439_v45 = vpack.c.bf16 %v1247_v44, %v1246_v43  ;;  %v1274_v46 = vld [vmem:[#allocation6 + $0x178] sm:$0xff]  ;;  %v1590_v43 = vpack.c.bf16 %v1283_v41, %v1282_v40  ;;  %v1303_v41 = vld [vmem:[#allocation6 + $0x260] sm:$0xff] }
 0x330   :  { %2230 = vmatprep.subr.mxu0 %v1063_v47  ;;  %2263 = vmatprep.subr.mxu1 %v1161_v48  ;;  %v1302_v40 = vld [vmem:[#allocation6 + $0x258] sm:$0xff] }
 0x331   :  { %2231 = vmatpush3.msra.mxu0 %v1063_v47  ;;  %2264 = vmatpush3.msra.mxu1 %v1161_v48  ;;  %v1275_v47 = vld [vmem:[#allocation6 + $0x180] sm:$0xff] }
 0x332   :  { %2232 = vmatprep.subr.mxu0 %v1062_v49  ;;  %2265 = vmatprep.subr.mxu1 %v1160_v50  ;;  %v1542_v48 = vpack.c.bf16 %v1275_v47, %v1274_v46  ;;  %v1281_v46 = vld [vmem:[#allocation6 + $0x1b0] sm:$0xff] }
 0x333   :  { %2233 = vmatpush3.msra.mxu0 %v1062_v49  ;;  %2266 = vmatpush3.msra.mxu1 %v1160_v50  ;;  %v1272_v49 = vld [vmem:[#allocation6 + $0x168] sm:$0xff]  ;;  %v1273_v50 = vld [vmem:[#allocation6 + $0x170] sm:$0xff] }
 0x334   :  { %2234 = vmatprep.subr.mxu0 %v1061_v51  ;;  %2267 = vmatprep.subr.mxu1 %v1159_v52 }
 0x335   :  { %2235 = vmatpush3.msra.mxu0 %v1061_v51  ;;  %2268 = vmatpush3.msra.mxu1 %v1159_v52  ;;  %v1541_v51 = vpack.c.bf16 %v1273_v50, %v1272_v49  ;;  %v1270_v52 = vld [vmem:[#allocation6 + $0x158] sm:$0xff]  ;;  %v1308_v50 = vld [vmem:[#allocation6 + $0x288] sm:$0xff] }
 0x336   :  { %2236 = vmatprep.subr.mxu0 %v1060_v53  ;;  %2269 = vmatprep.subr.mxu1 %v1158_v25 }
 0x337   :  { %2237 = vmatpush3.msra.mxu0 %v1060_v53  ;;  %2270 = vmatpush3.msra.mxu1 %v1158_v25  ;;  %v1271_v53 = vld [vmem:[#allocation6 + $0x160] sm:$0xff] }
 0x338   :  { %2238 = vmatprep.subr.mxu0 %v1059_v57  ;;  %2271 = vmatprep.subr.mxu1 %v1157_v58  ;;  %v1540_v25 = vpack.c.bf16 %v1271_v53, %v1270_v52 }
 0x339   :  { %2239 = vmatpush3.msra.mxu0 %v1059_v57  ;;  %2272 = vmatpush3.msra.mxu1 %v1157_v58  ;;  %v1268_v57 = vld [vmem:[#allocation6 + $0x148] sm:$0xff]  ;;  %v1269_v58 = vld [vmem:[#allocation6 + $0x150] sm:$0xff] }
 0x33a   :  { %2240 = vmatprep.subr.mxu0 %v1058_v59  ;;  %2273 = vmatprep.subr.mxu1 %v1156_v60 }
 0x33b   :  { %2241 = vmatpush3.msra.mxu0 %v1058_v59  ;;  %2274 = vmatpush3.msra.mxu1 %v1156_v60  ;;  %v1539_v59 = vpack.c.bf16 %v1269_v58, %v1268_v57  ;;  %v1266_v60 = vld [vmem:[#allocation6 + $0x138] sm:$0xff] }
 0x33c   :  { %2242 = vmatprep.subr.mxu0 %v1057_v61  ;;  %2275 = vmatprep.subr.mxu1 %v1155_v62 }
 0x33d   :  { %2243 = vmatpush3.msra.mxu0 %v1057_v61  ;;  %2276 = vmatpush3.msra.mxu1 %v1155_v62  ;;  %v1267_v61 = vld [vmem:[#allocation6 + $0x140] sm:$0xff] }
 0x33e   :  { %2244 = vmatprep.subr.mxu0 %v1056_v63  ;;  %2277 = vmatprep.subr.mxu1 %v1154_v0  ;;  %v1538_v62 = vpack.c.bf16 %v1267_v61, %v1266_v60  ;;  %v1279_v60 = vld [vmem:[#allocation6 + $0x1a0] sm:$0xff] }
 0x33f   :  { %2245 = vmatpush3.msra.mxu0 %v1056_v63  ;;  %2278 = vmatpush3.msra.mxu1 %v1154_v0  ;;  %v1264_v63 = vld [vmem:[#allocation6 + $0x128] sm:$0xff]  ;;  %v1265_v0 = vld [vmem:[#allocation6 + $0x130] sm:$0xff] }
 0x340   :  { %2246 = vmatprep.subr.mxu0 %v1055_v1  ;;  %2279 = vmatprep.subr.mxu1 %v1153_v2 }
 0x341   :  { %2247 = vmatpush3.msra.mxu0 %v1055_v1  ;;  %2280 = vmatpush3.msra.mxu1 %v1153_v2  ;;  %v1537_v1 = vpack.c.bf16 %v1265_v0, %v1264_v63  ;;  %v1262_v2 = vld [vmem:[#allocation6 + $0x118] sm:$0xff] }
 0x342   :  { %2248 = vmatprep.subr.mxu0 %v1054_v3  ;;  %2281 = vmatprep.subr.mxu1 %v1152_v4 }
 0x343   :  { %2249 = vmatpush3.msra.mxu0 %v1054_v3  ;;  %2282 = vmatpush3.msra.mxu1 %v1152_v4  ;;  %v1263_v3 = vld [vmem:[#allocation6 + $0x120] sm:$0xff] }
 0x344   :  { %2250 = vmatprep.subr.mxu0 %v1053_v5  ;;  %2283 = vmatprep.subr.mxu1 %v1151_v6  ;;  %v1536_v4 = vpack.c.bf16 %v1263_v3, %v1262_v2  ;;  %v1306_v3 = vld [vmem:[#allocation6 + $0x278] sm:$0xff] }
 0x345   :  { %2251 = vmatpush3.msra.mxu0 %v1053_v5  ;;  %2284 = vmatpush3.msra.mxu1 %v1151_v6  ;;  %v3067_v5 = vpop.permute.xlu1 %1339 }
 0x346   :  { %2252 = vmatprep.subr.mxu0 %v1052_v7  ;;  %2285 = vmatprep.subr.mxu1 %v1150_v8 }
 0x347   :  { %2253 = vmatpush3.msra.mxu0 %v1052_v7  ;;  %2286 = vmatpush3.msra.mxu1 %v1150_v8  ;;  %v3069_v7 = vpop.permute.xlu0 %1334 }
 0x348   :  { %2254 = vmatprep.subr.mxu0 %v1051_v9  ;;  %2287 = vmatprep.subr.mxu1 %v1149_v10 }
 0x349   :  { %2255 = vmatpush3.msra.mxu0 %v1051_v9  ;;  %2288 = vmatpush3.msra.mxu1 %v1149_v10 }
 0x34a   :  { %2256 = vmatprep.subr.mxu0 %v1050_v12  ;;  %2289 = vmatprep.subr.mxu1 %v1148_v13 }
 0x34b   :  { %2257 = vmatpush3.msra.mxu0 %v1050_v12  ;;  %2258 = vmatprep.mubr.msk.f32.mxu0 %vm864_vm6, %v2473_v56  ;;  %v1293_v12 = vld [vmem:[#allocation6 + $0x210] sm:$0xff] }
 0x34c   :  { %2290 = vmatpush3.msra.mxu1 %v1148_v13  ;;  %2259 = vmatmul.mubr.msk.f32.vlgmr.msra.gmra.mxu0 %vm865_vm7, %v2473_v56  ;;  %v1595_v20 = vpack.c.bf16 %v1293_v12, %v1292_v11 }
 0x34d   :  { %2291 = vmatprep.subr.mxu1 %v1147_v17  ;;  %2293 = vmatprep.mubr.msk.f32.mxu1 %vm864_vm6, %v2473_v56 }
 0x34e   :  { %2292 = vmatpush3.msra.mxu1 %v1147_v17  ;;  %2296 = vmatprep.subr.bf16.mxu0 %v2472_v29 }
 0x34f   :  { %2294 = vmatmul.mubr.msk.f32.vlgmr.msra.gmra.mxu1 %vm865_vm7, %v2473_v56  ;;  %2297 = vmatpush3.bf16.msra.mxu0 %v1446_v18  ;;  %v1255_v56 = vld [vmem:[#allocation6 + $0xe0] sm:$0xff] }
 0x350   :  { %2298 = vmatprep.subr.bf16.mxu0 %v2472_v29  ;;  %2316 = vmatprep.subr.bf16.mxu1 %v2472_v29  ;;  %v1443_v30 = vpack.c.bf16 %v1255_v56, %v1254_v55  ;;  %v1288_v56 = vld [vmem:[#allocation6 + $0x1e8] sm:$0xff] }
 0x351   :  { %2317 = vmatpush3.bf16.msra.mxu1 %v1492_v24  ;;  %2318 = vmatprep.mubr.msk.bf16.mxu1 %vm2474_vm8, %v2472_v29  ;;  %v1291_v24 = vld [vmem:[#allocation6 + $0x200] sm:$0xff] }
 0x352   :  { %2322 = vmatprep.subr.bf16.mxu1 %v2472_v29  ;;  %2312 = vmatprep.mubr.msk.bf16.mxu0 %vm2474_vm8, %v2472_v29 }
 0x353   :  { %2299 = vmatpush3.bf16.msra.mxu0 %v1445_v21 }
 0x354   :  { %2300 = vmatprep.subr.bf16.mxu0 %v2472_v29  ;;  %2319 = vmatmul.mubr.msk.bf16.vlgmr.msra.gmra.mxu1 %vm422_vm4, %v1436_v28 }
 0x355   :  { %2338 = vmatprep.mubr.msk.bf16.mxu1 %vm2474_vm8, %v2472_v29  ;;  %2323 = vmatpush3.bf16.msra.mxu1 %v1543_v42 }
 0x356   :  { %2324 = vmatprep.subr.bf16.mxu1 %v2472_v29 }
 0x357   :  { %2301 = vmatpush3.bf16.msra.mxu0 %v1444_v54  ;;  %v1594_v54 = vpack.c.bf16 %v1291_v24, %v1290_v23 }
 0x358   :  { %2302 = vmatprep.subr.bf16.mxu0 %v2472_v29 }
 0x359   :  { %2325 = vmatpush3.bf16.msra.mxu1 %v1542_v48 }
 0x35a   :  { %2326 = vmatprep.subr.bf16.mxu1 %v2472_v29 }
 0x35b   :  { %2303 = vmatpush3.bf16.msra.mxu0 %v1443_v30  ;;  %v1289_v30 = vld [vmem:[#allocation6 + $0x1f0] sm:$0xff] }
 0x35c   :  { %2304 = vmatprep.subr.bf16.mxu0 %v2472_v29 }
 0x35d   :  { %2327 = vmatpush3.bf16.msra.mxu1 %v1541_v51  ;;  %v1309_v51 = vld [vmem:[#allocation6 + $0x290] sm:$0xff] }
 0x35e   :  { %2328 = vmatprep.subr.bf16.mxu1 %v2472_v29  ;;  %v1647_v0 = vpack.c.bf16 %v1309_v51, %v1308_v50 }
 0x35f   :  { %2305 = vmatpush3.bf16.msra.mxu0 %v1442_v33  ;;  %v1593_v33 = vpack.c.bf16 %v1289_v30, %v1288_v56 }
 0x360   :  { %2306 = vmatprep.subr.bf16.mxu0 %v2472_v29 }
 0x361   :  { %2329 = vmatpush3.bf16.msra.mxu1 %v1540_v25 }
 0x362   :  { %2330 = vmatprep.subr.bf16.mxu1 %v2472_v29 }
 0x363   :  { %2307 = vmatpush3.bf16.msra.mxu0 %v1441_v36  ;;  %v1592_v36 = vpack.c.bf16 %v1287_v35, %v1286_v34 }
 0x364   :  { %2308 = vmatprep.subr.bf16.mxu0 %v2472_v29 }
 0x365   :  { %2331 = vmatpush3.bf16.msra.mxu1 %v1539_v59  ;;  %v1278_v59 = vld [vmem:[#allocation6 + $0x198] sm:$0xff] }
 0x366   :  { %2332 = vmatprep.subr.bf16.mxu1 %v2472_v29 }
 0x367   :  { %2309 = vmatpush3.bf16.msra.mxu0 %v1440_v39  ;;  %v1591_v39 = vpack.c.bf16 %v1285_v38, %v1284_v37 }
 0x368   :  { %2310 = vmatprep.subr.bf16.mxu0 %v2472_v29 }
 0x369   :  { %2333 = vmatpush3.bf16.msra.mxu1 %v1538_v62 }
 0x36a   :  { %2334 = vmatprep.subr.bf16.mxu1 %v2472_v29 }
 0x36b   :  { %2311 = vmatpush3.bf16.msra.mxu0 %v1439_v45  ;;  %v1280_v45 = vld [vmem:[#allocation6 + $0x1a8] sm:$0xff] }
 0x36c   :  { %2342 = vmatprep.subr.bf16.mxu0 %v2472_v29  ;;  %v1589_v25 = vpack.c.bf16 %v1281_v46, %v1280_v45 }
 0x36d   :  { %2335 = vmatpush3.bf16.msra.mxu1 %v1537_v1 }
 0x36e   :  { %2336 = vmatprep.subr.bf16.mxu1 %v2472_v29 }
 0x371   :  { %2337 = vmatpush3.bf16.msra.mxu1 %v1536_v4  ;;  %v1307_v4 = vld [vmem:[#allocation6 + $0x280] sm:$0xff] }
 0x372   :  { %2362 = vmatprep.subr.bf16.mxu1 %v2472_v29 }
 0x3eb   :  { %v2190_v6 = vpop.f32.mrf.mxu0 }
 0x3ec   :  { %v3072_v8 = vmul.f32 %v2190_v6, %v3067_v5 }
 0x3ed   :  { %v954_v9 = vpop.f32.mrf.mxu0  ;;  %v2225_v10 = vpop.f32.mrf.mxu1 }
 0x3ee   :  { %v3076_v13 = vmul.f32 %v3072_v8, %v3072_v8  ;;  %v3079_v14 = vmul.f32 %v3069_v7, %v954_v9  ;;  %v3082_v15 = vmul.f32 %v2225_v10, %v3067_v5  ;;  %v1387_v57 = vmul.f32 3.0, %v3072_v8 }
 0x3ef   :  { %v1035_v16 = vpop.f32.mrf.mxu1  ;;  %v1393_v61 = vmul.f32 2.0, %v3072_v8  ;;  %v1588_v10 = vpack.c.bf16 %v1279_v60, %v1278_v59 }
 0x3f0   :  { %v3086_v17 = vmul.f32 %v3079_v14, %v3079_v14  ;;  %v1361_v18 = vsub.f32 %v3082_v15, %v3076_v13  ;;  %v3091_v19 = vmul.f32 %v3069_v7, %v1035_v16  ;;  %v1438_v22 = vpack.c.bf16 %v3072_v8, %v3079_v14 }
 0x3f1   :  { %v1386_v1 = vmul.f32 3.0, %v3079_v14  ;;  %v1392_v9 = vmul.f32 2.0, %v3079_v14  ;;  %v1389_v12 = vmul.f32 %v1387_v57, %v3082_v15  ;;  %v1395_v16 = vmul.f32 %v1393_v61, %v3076_v13 }
 0x3f2   :  { %vm1363_vm0 = vcmp.ge.f32.partialorder %v1361_v18, 0.0  ;;  %v1365_v21 = vmul.f32 0.01, %v1361_v18  ;;  %v1360_v26 = vsub.f32 %v3091_v19, %v3086_v17  ;;  %2313 = vmatmul.mubr.bf16.vlgmr.msra.gmra.mxu0 %v1438_v22  ;;  %v1646_v22 = vpack.c.bf16 %v1307_v4, %v1306_v3  ;;  %v1297_v4 = vld [vmem:[#allocation6 + $0x230] sm:$0xff] }
 0x3f3   :  { %2343 = vmatpush3.bf16.msra.mxu0 %v1595_v20  ;;  %2358 = vmatprep.mubr.msk.bf16.mxu0 %vm2474_vm8, %v2472_v29  ;;  %v1394_v56 = vmul.f32 %v1392_v9, %v3086_v17  ;;  %v1405_v35 = vmul.f32 6.0, %v3076_v13  ;;  %v1410_v46 = vmul.f32 3.0, %v3086_v17  ;;  %v1411_v51 = vmul.f32 3.0, %v3076_v13 }
 0x3f4   :  { %v1367_v27 = vsel %vm1363_vm0, %v1361_v18, %v1365_v21  ;;  %vm1362_vm4 = vcmp.ge.f32.partialorder %v1360_v26, 0.0  ;;  %v1364_v28 = vmul.f32 0.01, %v1360_v26  ;;  %2344 = vmatprep.subr.bf16.mxu0 %v2472_v29  ;;  %v1399_v18 = vmul.f32 4.0, %v3072_v8 }
 0x3f5   :  { %v1369_v55 = vadd.f32 1e-06, %v1367_v27  ;;  %v1388_v21 = vmul.f32 %v1386_v1, %v3091_v19  ;;  %v1404_v8 = vmul.f32 6.0, %v3086_v17  ;;  %v1407_v50 = vmul.f32 %v1405_v35, %v3082_v15  ;;  %v1299_v1 = vld [vmem:[#allocation6 + $0x240] sm:$0xff] }
 0x3f6   :  { %v1366_v31 = vsel %vm1362_vm4, %v1360_v26, %v1364_v28  ;;  %v1398_v26 = vmul.f32 4.0, %v3079_v14  ;;  %v1304_v28 = vld [vmem:[#allocation6 + $0x268] sm:$0xff]  ;;  %v1412_v60 = vmul.f32 %v1410_v46, %v3086_v17  ;;  %v1413_v15 = vmul.f32 %v1411_v51, %v3076_v13 }
 0x3f7   :  { %2418 = vrsqrt.f32 %v1369_v55  ;;  %v1368_v32 = vadd.f32 1e-06, %v1366_v31  ;;  %2345 = vmatpush3.bf16.msra.mxu0 %v1594_v54  ;;  %vm1379_vm9 = vcmp.eq.f32.partialorder %v1369_v55, inf  ;;  %v1382_v53 = vand.u32 2147483648, %v1369_v55  ;;  %v1305_v54 = vld [vmem:[#allocation6 + $0x270] sm:$0xff]  ;;  %v1296_v13 = vld [vmem:[#allocation6 + $0x228] sm:$0xff] }
 0x3f8   :  { %2346 = vmatprep.subr.bf16.mxu0 %v2472_v29  ;;  %vm1381_vm12 = vcmp.eq.f32.partialorder %v1369_v55, 0.0  ;;  %v1645_v37 = vpack.c.bf16 %v1305_v54, %v1304_v28  ;;  %v1641_v9 = vpack.c.bf16 %v1297_v4, %v1296_v13  ;;  %v1320_v28 = vld [vmem:[#allocation6 + $0x2e8] sm:$0xff]  ;;  %v1321_v54 = vld [vmem:[#allocation6 + $0x2f0] sm:$0xff] }
 0x3f9   :  { %2420 = vrsqrt.f32 %v1368_v32  ;;  %vm1372_vm10 = vcmp.eq.f32.partialorder %v1368_v32, inf  ;;  %v1375_v52 = vand.u32 2147483648, %v1368_v32  ;;  %vm1374_vm11 = vcmp.eq.f32.partialorder %v1368_v32, 0.0 }
 0x3fb   :  { %2347 = vmatpush3.bf16.msra.mxu0 %v1593_v33 }
 0x3fc   :  { %2348 = vmatprep.subr.bf16.mxu0 %v2472_v29 }
 0x3ff   :  { %2349 = vmatpush3.bf16.msra.mxu0 %v1592_v36 }
 0x400   :  { %2350 = vmatprep.subr.bf16.mxu0 %v2472_v29 }
 0x403   :  { %2351 = vmatpush3.bf16.msra.mxu0 %v1591_v39 }
 0x404   :  { %v3103_v42 = vpop.eup %2418  ;;  %2352 = vmatprep.subr.bf16.mxu0 %v2472_v29 }
 0x405   :  { %v1378_v44 = vmul.f32 %v3103_v42, %v1369_v55 }
 0x406   :  { %v3107_v47 = vpop.eup %2420 }
 0x407   :  { %v1371_v48 = vmul.f32 %v3107_v47, %v1368_v32  ;;  %v1380_v49 = vsel %vm1379_vm9, %v1369_v55, %v1378_v44  ;;  %2353 = vmatpush3.bf16.msra.mxu0 %v1590_v43  ;;  %v1416_v39 = vmul.f32 %v3107_v47, %v3107_v47  ;;  %v1406_v43 = vmul.f32 %v1404_v8, %v3091_v19  ;;  %v1300_v19 = vld [vmem:[#allocation6 + $0x248] sm:$0xff] }
 0x408   :  { %2354 = vmatprep.subr.bf16.mxu0 %v2472_v29  ;;  %v1383_v63 = vsel %vm1381_vm12, %v1382_v53, %v1380_v49  ;;  %v1644_v53 = vpack.c.bf16 %v1303_v41, %v1302_v40  ;;  %v1709_v8 = vpack.c.bf16 %v1321_v54, %v1320_v28 }
 0x409   :  { %v1373_v58 = vsel %vm1372_vm10, %v1368_v32, %v1371_v48  ;;  %v3131_v32 = vmul.f32 %v3103_v42, %v3103_v42 }
 0x40a   :  { %v1376_v62 = vsel %vm1374_vm11, %v1375_v52, %v1373_v58  ;;  %v1301_v58 = vld [vmem:[#allocation6 + $0x250] sm:$0xff] }
 0x40b   :  { %v1535_v2 = vpack.c.bf16 %v1383_v63, %v1376_v62  ;;  %2355 = vmatpush3.bf16.msra.mxu0 %v1589_v25  ;;  %v1643_v63 = vpack.c.bf16 %v1301_v58, %v1300_v19 }
 0x40c   :  { %v2260_v6 = vpop.f32.mrf.mxu0  ;;  %2356 = vmatprep.subr.bf16.mxu0 %v2472_v29 }
 0x40d   :  { %v1353_v11 = vmul.f32 %v2260_v6, %v3067_v5  ;;  %2339 = vmatmul.mubr.bf16.vlgmr.msra.gmra.mxu1 %v1535_v2 }
 0x40e   :  { %v1132_v20 = vpop.f32.mrf.mxu0  ;;  %2363 = vmatpush3.bf16.msra.mxu1 %v1647_v0  ;;  %2378 = vmatprep.mubr.msk.bf16.mxu1 %vm2474_vm8, %v2472_v29  ;;  %v1298_v0 = vld [vmem:[#allocation6 + $0x238] sm:$0xff] }
 0x40f   :  { %v1391_v23 = vsub.f32 %v1353_v11, %v1389_v12  ;;  %v1352_v24 = vmul.f32 %v3069_v7, %v1132_v20  ;;  %v2295_v27 = vpop.f32.mrf.mxu1  ;;  %2364 = vmatprep.subr.bf16.mxu1 %v2472_v29  ;;  %v1401_v55 = vmul.f32 %v1399_v18, %v1353_v11  ;;  %2357 = vmatpush3.bf16.msra.mxu0 %v1588_v10  ;;  %v1294_v11 = vld [vmem:[#allocation6 + $0x218] sm:$0xff]  ;;  %v1295_v12 = vld [vmem:[#allocation6 + $0x220] sm:$0xff] }
 0x410   :  { %v1357_v30 = vmul.f32 %v2295_v27, %v3067_v5  ;;  %2382 = vmatprep.subr.bf16.mxu0 %v2472_v29  ;;  %v1642_v3 = vpack.c.bf16 %v1299_v1, %v1298_v0  ;;  %v1640_v18 = vpack.c.bf16 %v1295_v12, %v1294_v11 }
 0x411   :  { %v1397_v31 = vadd.f32 %v1395_v16, %v1391_v23  ;;  %v1390_v33 = vsub.f32 %v1352_v24, %v1388_v21  ;;  %v1400_v14 = vmul.f32 %v1398_v26, %v1352_v24  ;;  %v1229_v34 = vpop.f32.mrf.mxu1  ;;  %v1325_v23 = vld [vmem:[#allocation6 + $0x310] sm:$0xff]  ;;  %v1322_v21 = vld [vmem:[#allocation6 + $0x2f8] sm:$0xff]  ;;  %v1323_v26 = vld [vmem:[#allocation6 + $0x300] sm:$0xff] }
 0x412   :  { %v1356_v36 = vmul.f32 %v3069_v7, %v1229_v34  ;;  %2365 = vmatpush3.bf16.msra.mxu1 %v1646_v22  ;;  %v1403_v44 = vsub.f32 %v1357_v30, %v1401_v55  ;;  %v1324_v22 = vld [vmem:[#allocation6 + $0x308] sm:$0xff]  ;;  %v1710_v27 = vpack.c.bf16 %v1323_v26, %v1322_v21  ;;  %v1318_v55 = vld [vmem:[#allocation6 + $0x2d8] sm:$0xff]  ;;  %v1315_v34 = vld [vmem:[#allocation6 + $0x2c0] sm:$0xff] }
 0x413   :  { %v1419_v38 = vmul.f32 %v3131_v32, %v1397_v31  ;;  %v1396_v5 = vadd.f32 %v1394_v56, %v1390_v33  ;;  %2366 = vmatprep.subr.bf16.mxu1 %v2472_v29  ;;  %v1711_v24 = vpack.c.bf16 %v1325_v23, %v1324_v22  ;;  %v1319_v56 = vld [vmem:[#allocation6 + $0x2e0] sm:$0xff]  ;;  %v1316_v31 = vld [vmem:[#allocation6 + $0x2c8] sm:$0xff] }
 0x414   :  { %v1402_v45 = vsub.f32 %v1356_v36, %v1400_v14  ;;  %v3142_v48 = vpop.f32.mrf.mxu1  ;;  %v1409_v59 = vadd.f32 %v1407_v50, %v1403_v44  ;;  %v1708_v30 = vpack.c.bf16 %v1319_v56, %v1318_v55  ;;  %v1314_v14 = vld [vmem:[#allocation6 + $0x2b8] sm:$0xff]  ;;  %v1312_v36 = vld [vmem:[#allocation6 + $0x2a8] sm:$0xff] }
 0x415   :  { %v1421_v7 = vmul.f32 %v3103_v42, %v1419_v38  ;;  %v1418_v49 = vmul.f32 %v1416_v39, %v1396_v5  ;;  %v1706_v35 = vpack.c.bf16 %v1315_v34, %v1314_v14  ;;  %v1310_v5 = vld [vmem:[#allocation6 + $0x298] sm:$0xff] }
 0x416   :  { %v1408_v52 = vadd.f32 %v1406_v43, %v1402_v45  ;;  %2367 = vmatpush3.bf16.msra.mxu1 %v1645_v37  ;;  %v2320_v25 = vpop.f32.mrf.mxu1  ;;  %v1415_v2 = vsub.f32 %v1409_v59, %v1413_v15  ;;  %v1313_v37 = vld [vmem:[#allocation6 + $0x2b0] sm:$0xff]  ;;  %v1885_v59 = vld [vmem:[%s3195_s7 + $0x2] ss:$0 sm:$0xff] }
 0x417   :  { %v1420_v57 = vmul.f32 %v3107_v47, %v1418_v49  ;;  %2368 = vmatprep.subr.bf16.mxu1 %v2472_v29  ;;  %vm1427_vm13 = vcmp.ne.f32.partialorder %v1421_v7, %v1421_v7  ;;  %v1705_v38 = vpack.c.bf16 %v1313_v37, %v1312_v36 }
 0x418   :  { %v3150_v42 = vpop.f32.mrf.mxu1  ;;  %vm1875_vm15 = vmneg %vm1427_vm13  ;;  %v1414_v62 = vsub.f32 %v1408_v52, %v1412_v60  ;;  %v1423_v6 = vmul.f32 %v3131_v32, %v1415_v2 }
 0x419   :  { %v1878_v61 = vpack.c.bf16 %v1421_v7, %v1420_v57  ;;  %vm1426_vm14 = vcmp.ne.f32.partialorder %v1420_v57, %v1420_v57 }
 0x41a   :  { %2369 = vmatpush3.bf16.msra.mxu1 %v1644_v53  ;;  %vm1876_vm2 = vmneg %vm1426_vm14  ;;  %v2321_v47 = vpop.f32.mrf.mxu1  ;;  %v1422_v17 = vmul.f32 %v1416_v39, %v1414_v62  ;;  %v1425_v16 = vmul.f32 %v1423_v6, %v3131_v32  ;;  %v1317_v32 = vld [vmem:[#allocation6 + $0x2d0] sm:$0xff] }
 0x41b   :  { %vm1877_vm3 = vmpackc.low %vm1875_vm15, %vm1876_vm2  ;;  %2370 = vmatprep.subr.bf16.mxu1 %v2472_v29  ;;  %v1707_v33 = vpack.c.bf16 %v1317_v32, %v1316_v31 }
 0x41c   :  { %2359 = vmatmul.mubr.msk.bf16.vlgmr.msra.gmra.mxu0 %vm1877_vm3, %v1878_v61  ;;  %v1424_v10 = vmul.f32 %v1422_v17, %v1416_v39  ;;  %vm1431_vm5 = vcmp.ne.f32.partialorder %v1425_v16, %v1425_v16  ;;  %v1311_v39 = vld [vmem:[#allocation6 + $0x2a0] sm:$0xff] }
 0x41d   :  { %2398 = vmatprep.mubr.msk.bf16.mxu0 %vm2474_vm8, %v2472_v29  ;;  %vm1880_vm7 = vmneg %vm1431_vm5  ;;  %2383 = vmatpush3.bf16.msra.mxu0 %v1711_v24  ;;  %v1704_v40 = vpack.c.bf16 %v1311_v39, %v1310_v5 }
 0x41e   :  { %2371 = vmatpush3.bf16.msra.mxu1 %v1643_v63  ;;  %vm1430_vm1 = vcmp.ne.f32.partialorder %v1424_v10, %v1424_v10  ;;  %v1883_v20 = vpack.c.bf16 %v1425_v16, %v1424_v10  ;;  %2384 = vmatprep.subr.bf16.mxu0 %v2472_v29 }
 0x41f   :  { %2372 = vmatprep.subr.bf16.mxu1 %v2472_v29  ;;  %vm1881_vm6 = vmneg %vm1430_vm1 }
 0x420   :  { %vm1882_vm8 = vmpackc.low %vm1880_vm7, %vm1881_vm6 }
 0x421   :  { %2385 = vmatpush3.bf16.msra.mxu0 %v1710_v27 }
 0x422   :  { %2373 = vmatpush3.bf16.msra.mxu1 %v1642_v3  ;;  %2386 = vmatprep.subr.bf16.mxu0 %v2472_v29 }
 0x423   :  { %2374 = vmatprep.subr.bf16.mxu1 %v2472_v29 }
 0x425   :  { %2387 = vmatpush3.bf16.msra.mxu0 %v1709_v8 }
 0x426   :  { %2375 = vmatpush3.bf16.msra.mxu1 %v1641_v9  ;;  %2388 = vmatprep.subr.bf16.mxu0 %v2472_v29  ;;  %v1886_v9 = vld [vmem:[%s3195_s7 + $0x3] ss:$0 sm:$0xff] }
 0x427   :  { %2376 = vmatprep.subr.bf16.mxu1 %v2472_v29 }
 0x429   :  { %2389 = vmatpush3.bf16.msra.mxu0 %v1708_v30 }
 0x42a   :  { %2377 = vmatpush3.bf16.msra.mxu1 %v1640_v18  ;;  %2390 = vmatprep.subr.bf16.mxu0 %v2472_v29 }
 0x42d   :  { %2379 = vmatmul.mubr.msk.bf16.vlgmr.msra.gmra.mxu1 %vm1882_vm8, %v1883_v20  ;;  %2391 = vmatpush3.bf16.msra.mxu0 %v1707_v33 }
 0x42e   :  { %2392 = vmatprep.subr.bf16.mxu0 %v2472_v29 }
 0x431   :  { %2393 = vmatpush3.bf16.msra.mxu0 %v1706_v35 }
 0x432   :  { %2394 = vmatprep.subr.bf16.mxu0 %v2472_v29 }
 0x435   :  { %2395 = vmatpush3.bf16.msra.mxu0 %v1705_v38  ;;  %v1887_v38 = vld [vmem:[%s3195_s7 + $0x4] ss:$0 sm:$0xff] }
 0x436   :  { %2396 = vmatprep.subr.bf16.mxu0 %v2472_v29 }
 0x439   :  { %2397 = vmatpush3.bf16.msra.mxu0 %v1704_v40 }
 0x4b2   :  { %v1481_v41 = vpop.f32.mrf.mxu0 }
 0x4b3   :  { %v1529_v57 = vadd.f32 %v3142_v48, %v1481_v41  ;;  %v1888_v41 = vld [vmem:[%s3195_s7 + $0x5] ss:$0 sm:$0xff] }
 0x4b4   :  { %v2314_v43 = vpop.f32.mrf.mxu0 }
 0x4b6   :  { %v1484_v44 = vpop.f32.mrf.mxu0 }
 0x4b7   :  { %v1532_v29 = vadd.f32 %v3150_v42, %v1484_v44 }
 0x4b8   :  { %v2315_v45 = vpop.f32.mrf.mxu0 }
 0x4cd   :  { %v1578_v46 = vpop.f32.mrf.mxu1 }
 0x4ce   :  { %v1585_v19 = vadd.f32 %v1578_v46, %v1529_v57 }
 0x4cf   :  { %v2340_v7 = vpop.f32.mrf.mxu1 }
 0x4d1   :  { %v1581_v49 = vpop.f32.mrf.mxu1 }
 0x4d2   :  { %v1586_v61 = vadd.f32 %v1581_v49, %v1532_v29 }
 0x4d3   :  { %v2341_v50 = vpop.f32.mrf.mxu1 }
 0x4dc   :  { %v1630_v51 = vpop.f32.mrf.mxu0 }
 0x4dd   :  { %v1637_v58 = vadd.f32 %v1630_v51, %v1585_v19 }
 0x4de   :  { %v2360_v52 = vpop.f32.mrf.mxu0 }
 0x4e0   :  { %v1633_v53 = vpop.f32.mrf.mxu0 }
 0x4e1   :  { %v1638_v63 = vadd.f32 %v1633_v53, %v1586_v61 }
 0x4e2   :  { %v2361_v25 = vpop.f32.mrf.mxu0 }
 0x4ed   :  { %v1682_v60 = vpop.f32.mrf.mxu1 }
 0x4ee   :  { %v1689_v15 = vadd.f32 %v1682_v60, %v1637_v58 }
 0x4ef   :  { %v2380_v62 = vpop.f32.mrf.mxu1 }
 0x4f0   :  { %v1695_v47 = vadd.f32 %v1885_v59, %v1689_v15 }
 0x4f1   :  { %v1685_v0 = vpop.f32.mrf.mxu1 }
 0x4f2   :  { %v1690_v1 = vadd.f32 %v1685_v0, %v1638_v63  ;;  %v1699_v17 = vmul.f32 0.1, %v1695_v47  ;;  %vm1697_vm0 = vcmp.ge.f32.partialorder %v1695_v47, 0.0 }
 0x4f3   :  { %v2381_v2 = vpop.f32.mrf.mxu1 }
 0x4f4   :  { %v1696_v3 = vadd.f32 %v1885_v59, %v1690_v1  ;;  %v1701_v42 = vsel %vm1697_vm0, %v1695_v47, %v1699_v17 }
 0x4f6   :  { %vm1698_vm4 = vcmp.ge.f32.partialorder %v1696_v3, 0.0  ;;  %v1700_v48 = vmul.f32 0.1, %v1696_v3 }
 0x4f8   :  { %v1702_v13 = vsel %vm1698_vm4, %v1696_v3, %v1700_v48 }
 0x4f9   :  { %v1703_v4 = vpack.c.bf16 %v1702_v13, %v1701_v42 }
 0x4fb   :  { %2399 = vmatmul.mubr.bf16.vlgmr.msra.gmra.mxu0 %v1703_v4 }
 0x5bb   :  { %v1750_v6 = vpop.f32.mrf.mxu0 }
 0x5bc   :  { %v1751_v12 = vadd.f32 %v1886_v9, %v1750_v6 }
 0x5bd   :  { %v2400_v10 = vpop.f32.mrf.mxu0 }
 0x5bf   :  { %v1753_v11 = vpop.f32.mrf.mxu0 }
 0x5c0   :  { %v1754_v16 = vadd.f32 %v1886_v9, %v1753_v11 }
 0x5c1   :  { %v2401_v18 = vpop.f32.mrf.mxu0 }
 0x5c2   :  { %v1757_v20 = vadd.f32 %v1754_v16, %v1751_v12 }
 0x5c4   :  { %v1758_v22 = vrot.slane %v1757_v20, 4 }
 0x5c6   :  { %v1759_v23 = vadd.f32 %v1758_v22, %v1757_v20 }
 0x5c8   :  { %v1760_v24 = vrot.slane %v1759_v23, 2 }
 0x5ca   :  { %v1761_v21 = vadd.f32 %v1760_v24, %v1759_v23 }
 0x5cc   :  { %v1762_v26 = vrot.slane %v1761_v21, 1 }
 0x5ce   :  { %v1763_v27 = vadd.f32 %v1762_v26, %v1761_v21 }
 0x5d0   :  { %v1765_v28 = vmul.f32 0.0625, %v1763_v27 }
 0x5d2   :  { %v1766_v54 = vsub.f32 %v1751_v12, %v1765_v28  ;;  %v1767_v8 = vsub.f32 %v1754_v16, %v1765_v28 }
 0x5d4   :  { %v1768_v55 = vmul.f32 %v1766_v54, %v1766_v54  ;;  %v1769_v56 = vmul.f32 %v1767_v8, %v1767_v8  ;;  %v1782_v5 = vmul.f32 %v1887_v38, %v1766_v54  ;;  %v1783_v39 = vmul.f32 %v1887_v38, %v1767_v8 }
 0x5d6   :  { %v1770_v30 = vadd.f32 %v1769_v56, %v1768_v55 }
 0x5d8   :  { %v1771_v31 = vrot.slane %v1770_v30, 4 }
 0x5da   :  { %v1772_v32 = vadd.f32 %v1771_v31, %v1770_v30 }
 0x5dc   :  { %v1773_v33 = vrot.slane %v1772_v32, 2 }
 0x5de   :  { %v1774_v14 = vadd.f32 %v1773_v33, %v1772_v32 }
 0x5e0   :  { %v1775_v34 = vrot.slane %v1774_v14, 1 }
 0x5e2   :  { %v1776_v35 = vadd.f32 %v1775_v34, %v1774_v14 }
 0x5e4   :  { %v1777_v36 = vmul.f32 0.0625, %v1776_v35 }
 0x5e6   :  { %v1784_v37 = vadd.f32 1e-05, %v1777_v36 }
 0x5e8   :  { %2422 = vrsqrt.f32 %v1784_v37 }
 0x5f5   :  { %v2423_v40 = vpop.eup %2422 }
 0x5f6   :  { %v1787_v43 = vmul.f32 %v2423_v40, %v1783_v39  ;;  %v1786_v44 = vmul.f32 %v2423_v40, %v1782_v5 }
 0x5f8   :  { %v1792_v45 = vadd.f32 %v1888_v41, %v1786_v44  ;;  %v1793_v46 = vadd.f32 %v1888_v41, %v1787_v43 }
 0x5fa   :  { %1794 = vst [vmem:[#allocation9] sm:$0xff] %v1792_v45  ;;  %1795 = vst [vmem:[#allocation9 + $0x8] sm:$0xff] %v1793_v46 }
 0x5fb   :  { %2455 = shalt.err (!%p2452_p9)
}
 0x5fc   :  { %1807 = dma.vmem_to_hbm [thread:$0]  %s1802_s1, 256, %s3196_s8, [#allocation8], %s2469_s30, %s2469_s30, %s2470_s9  }
 0x5fd   :  { %2466 = dma.done.wait [#allocation8], 256  }
 0x5fe   :  { %2467 = vsyncadd [#allocation8], 4294967040 }
 0x5ff   :  { %1811 = vsyncpa [#allocation7], 1 }
 0x600   :  { %1812 = vsyncpa [#allocation8], 1 }

</bundles_post_ra>
